<compile_context>
chip_gen: v7x
topology: tpu7x:2x2x1
jax: 0.10.0
libtpu: 0.0.40
codegen_flags: <defaults>
</compile_context>

<pallas_src>
import jax
import jax.numpy as jnp
from jax.experimental import pallas as pl
from jax.experimental.pallas import tpu as pltpu


# ----------------------------- kernel ---------------------------------------


def _fused_autoencoder_kernel(x_ref, h0_ref, c0_ref,
                              enc_wih_ref, enc_whh_ref, enc_b_ref,
                              dec_whh_ref, dec_b_ref,
                              lin_w_ref, lin_b_ref,
                              pscale_ref, pbias_ref,
                              out_ref, hfin_ref, cfin_ref,
                              xproj_sc, dech_sc):
    """Encoder LSTM -> decoder LSTM (zero input) -> Linear, fully fused."""
    B, L, I = x_ref.shape
    H = h0_ref.shape[-1]

    # Hoist all weight loads and broadcasts out of the serial loops
    # (JAX does not CSE broadcast_in_dim).
    enc_wih = enc_wih_ref[...]                              # (I, 4H) i|f|o cols pre-scaled
    enc_whh = enc_whh_ref[...]                              # (H, 4H)
    dec_whh = dec_whh_ref[...]                              # (H, 4H)
    enc_b = enc_b_ref[...]                                  # (1, 4H)
    lin_w = lin_w_ref[...]                                  # (H, I)
    lin_b = lin_b_ref[...]                                  # (1, I)
    dec_b = jnp.broadcast_to(dec_b_ref[...], (B, 4 * H))    # (B, 4H)
    post_scale = jnp.broadcast_to(pscale_ref[...], (B, 4 * H))
    post_bias = jnp.broadcast_to(pbias_ref[...], (B, 4 * H))

    def gates_to_state(gates, c):
        # All four nonlinearities via ONE tanh over the packed (B, 4H) vreg.
        # i|f|o columns arrive pre-scaled by 0.5 (folded into the weights in
        # the wrapper), so sigmoid(x) = 0.5 * tanh(x/2) + 0.5 there, while the
        # g column (scale 1, bias 0) stays a plain tanh.
        act = jnp.tanh(gates) * post_scale + post_bias
        i = act[:, 0:H]
        f = act[:, H:2 * H]
        g = act[:, 2 * H:3 * H]
        o = act[:, 3 * H:4 * H]
        c_new = f * c + i * g
        h_new = o * jnp.tanh(c_new)
        return h_new, c_new

    # ---- prologue: ONE flattened input-projection matmul -------------------
    xproj = jnp.dot(x_ref[...].reshape(B * L, I), enc_wih,
                    preferred_element_type=jnp.float32) + enc_b       # (B*L, 4H)
    # One-time reorder into a time-major scratch (off the serial path) so each
    # encoder step reads a contiguous (B, 4H) tile.  B tiny strided writes.
    for b in range(B):
        xproj_sc[:, b, :] = xproj[b * L:(b + 1) * L, :]

    # ---- encoder recurrence (L static -> full unroll) -----------------------
    h = h0_ref[...]                                          # (B, H)
    c = c0_ref[...]                                          # (B, H)
    for t in range(L):
        gates = xproj_sc[t] + jnp.dot(h, enc_whh,
                                      preferred_element_type=jnp.float32)
        h, c = gates_to_state(gates, c)

    # Final encoder state written exactly once.
    hfin_ref[...] = h
    cfin_ref[...] = c

    # ---- decoder recurrence (all-zero input => x @ W_ih vanishes) ----------
    hs = []
    for t in range(L):
        gates = jnp.dot(h, dec_whh, preferred_element_type=jnp.float32) + dec_b
        h, c = gates_to_state(gates, c)
        hs.append(h)             # kept as values: no stores on the serial chain

    # Spill collected hiddens batch-major AFTER the loop (off the critical
    # path); with L == sublane tile the (B, L, H) -> (B*L, H) merge is free.
    for t in range(L):
        dech_sc[:, t, :] = hs[t]

    # ---- epilogue: ONE flattened Linear matmul + ONE batch-first store -----
    dec_h = dech_sc[...].reshape(B * L, H)
    out = jnp.dot(dec_h, lin_w, preferred_element_type=jnp.float32) + lin_b
    out_ref[...] = out.reshape(B, L, I)


# ----------------------------- wrapper --------------------------------------


def _forward_impl(params, x, h_enc):
    """x: (B, L, I) f32;  h_enc = (h0, c0), each (1, B, H) f32."""
    B, L, I = x.shape
    H = params["enc_whh"].shape[1]

    h0 = h_enc[0][0]                                         # (B, H)
    c0 = h_enc[1][0]                                         # (B, H)

    # One-time parameter prep (tiny, outside the kernel):
    #  * transpose weights so the kernel does plain row-major matmuls,
    #  * fuse b_ih + b_hh,
    #  * fold the 0.5 pre-scale of the sigmoid-via-tanh trick into the i|f|o
    #    gate columns (PyTorch gate order i, f, g, o along the 4H axis).
    half = jnp.full((H,), 0.5, jnp.float32)
    one = jnp.ones((H,), jnp.float32)
    zero = jnp.zeros((H,), jnp.float32)
    col_scale = jnp.concatenate([half, half, one, half])     # (4H,)
    post_scale = col_scale.reshape(1, 4 * H)
    post_bias = jnp.concatenate([half, half, zero, half]).reshape(1, 4 * H)

    enc_wih_t = params["enc_wih"].T * col_scale              # (I, 4H)
    enc_whh_t = params["enc_whh"].T * col_scale              # (H, 4H)
    dec_whh_t = params["dec_whh"].T * col_scale              # (H, 4H)
    enc_b = ((params["enc_bih"] + params["enc_bhh"]) * col_scale).reshape(1, 4 * H)
    dec_b = ((params["dec_bih"] + params["dec_bhh"]) * col_scale).reshape(1, 4 * H)
    lin_w_t = params["lin_w"].T                              # (H, I)
    lin_b = params["lin_b"].reshape(1, I)

    out, h_fin, c_fin = pl.pallas_call(
        _fused_autoencoder_kernel,
        out_shape=(jax.ShapeDtypeStruct((B, L, I), jnp.float32),
                   jax.ShapeDtypeStruct((B, H), jnp.float32),
                   jax.ShapeDtypeStruct((B, H), jnp.float32)),
        scratch_shapes=[
            pltpu.VMEM((L, B, 4 * H), jnp.float32),          # time-major x projection
            pltpu.VMEM((B, L, H), jnp.float32),              # decoder hiddens (batch-major)
        ],
    )(x, h0, c0, enc_wih_t, enc_whh_t, enc_b, dec_whh_t, dec_b,
      lin_w_t, lin_b, post_scale, post_bias)

    return out, (h_fin[None], c_fin[None])                   # h_enc: (1, B, H)


lstm_autoencoder_forward = jax.jit(_forward_impl)


# ----------------------------- reference ------------------------------------


def _lstm_ref(x_seq, h0, c0, wih, whh, bih, bhh):
    H = whh.shape[1]

    def step(carry, x_t):
        h, c = carry
        gates = x_t @ wih.T + bih + h @ whh.T + bhh
        i = jax.nn.sigmoid(gates[:, :H])
        f = jax.nn.sigmoid(gates[:, H:2 * H])
        g = jnp.tanh(gates[:, 2 * H:3 * H])
        o = jax.nn.sigmoid(gates[:, 3 * H:])
        c = f * c + i * g
        h = o * jnp.tanh(c)
        return (h, c), h

    (h, c), hs = jax.lax.scan(step, (h0, c0), jnp.transpose(x_seq, (1, 0, 2)))
    return jnp.transpose(hs, (1, 0, 2)), h, c


def _forward_ref(params, x, h_enc):
    B, L, I = x.shape
    H = params["enc_whh"].shape[1]
    _, h, c = _lstm_ref(x, h_enc[0][0], h_enc[1][0],
                        params["enc_wih"], params["enc_whh"],
                        params["enc_bih"], params["enc_bhh"])
    zeros_in = jnp.zeros((B, L, H), jnp.float32)
    hs, _, _ = _lstm_ref(zeros_in, h, c,
                         params["dec_wih"], params["dec_whh"],
                         params["dec_bih"], params["dec_bhh"])
    out = hs @ params["lin_w"].T + params["lin_b"]
    return out, (h[None], c[None])


# ----------------------------- main ------------------------------------------


def _init_params(key, input_dim, hidden_dim):
    k = 1.0 / jnp.sqrt(jnp.float32(hidden_dim))
    keys = jax.random.split(key, 11)
    u = lambda kk, shape: jax.random.uniform(kk, shape, jnp.float32, -k, k)
    return {
        "enc_wih": u(keys[0], (4 * hidden_dim, input_dim)),
        "enc_whh": u(keys[1], (4 * hidden_dim, hidden_dim)),
        "enc_bih": u(keys[2], (4 * hidden_dim,)),
        "enc_bhh": u(keys[3], (4 * hidden_dim,)),
        "dec_wih": u(keys[4], (4 * hidden_dim, hidden_dim)),  # unused (zero decoder input)
        "dec_whh": u(keys[5], (4 * hidden_dim, hidden_dim)),
        "dec_bih": u(keys[6], (4 * hidden_dim,)),
        "dec_bhh": u(keys[7], (4 * hidden_dim,)),
        "lin_w": u(keys[8], (input_dim, hidden_dim)),
        "lin_b": u(keys[9], (input_dim,)),
    }


if __name__ == "__main__":
    B, L, I, H = 2, 8, 16, 32

    key = jax.random.PRNGKey(0)
    kp, kx = jax.random.split(key)
    params = _init_params(kp, I, H)
    x = jax.random.normal(kx, (B, L, I), jnp.float32)
    # reset_hidden(): zero initial hidden / cell states, shape (1, B, H)
    h_enc = (jnp.zeros((1, B, H), jnp.float32),
             jnp.zeros((1, B, H), jnp.float32))

    out, (h_out, c_out) = jax.block_until_ready(
        lstm_autoencoder_forward(params, x, h_enc))

    out_ref, (h_ref, c_ref) = _forward_ref(params, x, h_enc)

    assert out.shape == (B, L, I) and h_out.shape == (1, B, H)
    assert jnp.allclose(out, out_ref, atol=5e-3, rtol=5e-3)
    assert jnp.allclose(h_out, h_ref, atol=5e-3, rtol=5e-3)
    assert jnp.allclose(c_out, c_ref, atol=5e-3, rtol=5e-3)

    print("KERNEL_OK")
</pallas_src>

<mosaic_0001>
module attributes {stable_mosaic.version = 11 : i64} {
  func.func @_fused_autoencoder_kernel(%arg0: memref<2x8x16xf32, #tpu.memory_space<vmem>>, %arg1: memref<2x32xf32, #tpu.memory_space<vmem>>, %arg2: memref<2x32xf32, #tpu.memory_space<vmem>>, %arg3: memref<16x128xf32, #tpu.memory_space<vmem>>, %arg4: memref<32x128xf32, #tpu.memory_space<vmem>>, %arg5: memref<1x128xf32, #tpu.memory_space<vmem>>, %arg6: memref<32x128xf32, #tpu.memory_space<vmem>>, %arg7: memref<1x128xf32, #tpu.memory_space<vmem>>, %arg8: memref<32x16xf32, #tpu.memory_space<vmem>>, %arg9: memref<1x16xf32, #tpu.memory_space<vmem>>, %arg10: memref<1x128xf32, #tpu.memory_space<vmem>>, %arg11: memref<1x128xf32, #tpu.memory_space<vmem>>, %arg12: memref<2x8x16xf32, #tpu.memory_space<vmem>>, %arg13: memref<2x32xf32, #tpu.memory_space<vmem>>, %arg14: memref<2x32xf32, #tpu.memory_space<vmem>>, %arg15: memref<8x2x128xf32, #tpu.memory_space<vmem>>, %arg16: memref<2x8x32xf32, #tpu.memory_space<vmem>>) attributes {dimension_semantics = [], scalar_prefetch = 0 : i64, scratch_operands = 2 : i64, tpu.core_type = #tpu.core_type<tc>} {
    %c0 = arith.constant 0 : index
    %c0_0 = arith.constant 0 : index
    %0 = vector.load %arg3[%c0, %c0_0] : memref<16x128xf32, #tpu.memory_space<vmem>>, vector<16x128xf32>
    %c0_1 = arith.constant 0 : index
    %c0_2 = arith.constant 0 : index
    %1 = vector.load %arg4[%c0_1, %c0_2] : memref<32x128xf32, #tpu.memory_space<vmem>>, vector<32x128xf32>
    %c0_3 = arith.constant 0 : index
    %c0_4 = arith.constant 0 : index
    %2 = vector.load %arg6[%c0_3, %c0_4] : memref<32x128xf32, #tpu.memory_space<vmem>>, vector<32x128xf32>
    %c0_5 = arith.constant 0 : index
    %c0_6 = arith.constant 0 : index
    %3 = vector.load %arg5[%c0_5, %c0_6] : memref<1x128xf32, #tpu.memory_space<vmem>>, vector<1x128xf32>
    %c0_7 = arith.constant 0 : index
    %c0_8 = arith.constant 0 : index
    %4 = vector.load %arg8[%c0_7, %c0_8] : memref<32x16xf32, #tpu.memory_space<vmem>>, vector<32x16xf32>
    %c0_9 = arith.constant 0 : index
    %c0_10 = arith.constant 0 : index
    %5 = vector.load %arg9[%c0_9, %c0_10] : memref<1x16xf32, #tpu.memory_space<vmem>>, vector<1x16xf32>
    %c0_11 = arith.constant 0 : index
    %c0_12 = arith.constant 0 : index
    %6 = vector.load %arg7[%c0_11, %c0_12] : memref<1x128xf32, #tpu.memory_space<vmem>>, vector<1x128xf32>
    %7 = vector.shape_cast %6 : vector<1x128xf32> to vector<1x128xf32>
    %8 = vector.broadcast %7 : vector<1x128xf32> to vector<2x128xf32>
    %c0_13 = arith.constant 0 : index
    %c0_14 = arith.constant 0 : index
    %9 = vector.load %arg10[%c0_13, %c0_14] : memref<1x128xf32, #tpu.memory_space<vmem>>, vector<1x128xf32>
    %10 = vector.shape_cast %9 : vector<1x128xf32> to vector<1x128xf32>
    %11 = vector.broadcast %10 : vector<1x128xf32> to vector<2x128xf32>
    %c0_15 = arith.constant 0 : index
    %c0_16 = arith.constant 0 : index
    %12 = vector.load %arg11[%c0_15, %c0_16] : memref<1x128xf32, #tpu.memory_space<vmem>>, vector<1x128xf32>
    %13 = vector.shape_cast %12 : vector<1x128xf32> to vector<1x128xf32>
    %14 = vector.broadcast %13 : vector<1x128xf32> to vector<2x128xf32>
    %c0_17 = arith.constant 0 : index
    %c0_18 = arith.constant 0 : index
    %c0_19 = arith.constant 0 : index
    %15 = vector.load %arg0[%c0_17, %c0_18, %c0_19] : memref<2x8x16xf32, #tpu.memory_space<vmem>>, vector<2x8x16xf32>
    %16 = vector.shape_cast %15 : vector<2x8x16xf32> to vector<16x16xf32>
    %cst = arith.constant dense<0.000000e+00> : vector<16x128xf32>
    %17 = tpu.matmul %16, %0, %cst {dimension_numbers = #tpu.dot_dimension_numbers<[1], [0], [0], [1], [0, 0, 1, 1], [], []>} : vector<16x16xf32>, vector<16x128xf32>, vector<16x128xf32> -> vector<16x128xf32>
    %18 = vector.broadcast %3 : vector<1x128xf32> to vector<16x128xf32>
    %19 = arith.addf %17, %18 : vector<16x128xf32>
    %20 = vector.extract_strided_slice %19 {offsets = [0, 0], sizes = [8, 128], strides = [1, 1]} : vector<16x128xf32> to vector<8x128xf32>
    %c0_20 = arith.constant 0 : index
    %c0_21 = arith.constant 0 : index
    %c0_22 = arith.constant 0 : index
    %21 = vector.load %arg15[%c0_20, %c0_21, %c0_22] : memref<8x2x128xf32, #tpu.memory_space<vmem>>, vector<8x1x128xf32>
    %22 = vector.shape_cast %21 : vector<8x1x128xf32> to vector<8x128xf32>
    %23 = vector.shape_cast %20 : vector<8x128xf32> to vector<8x1x128xf32>
    tpu.vector_store %arg15[%c0_20, %c0_21, %c0_22], %23 {strides = array<i32>} : memref<8x2x128xf32, #tpu.memory_space<vmem>>, vector<8x1x128xf32>,
    %24 = vector.extract_strided_slice %19 {offsets = [8, 0], sizes = [8, 128], strides = [1, 1]} : vector<16x128xf32> to vector<8x128xf32>
    %c0_23 = arith.constant 0 : index
    %c1 = arith.constant 1 : index
    %c0_24 = arith.constant 0 : index
    %25 = vector.load %arg15[%c0_23, %c1, %c0_24] : memref<8x2x128xf32, #tpu.memory_space<vmem>>, vector<8x1x128xf32>
    %26 = vector.shape_cast %25 : vector<8x1x128xf32> to vector<8x128xf32>
    %27 = vector.shape_cast %24 : vector<8x128xf32> to vector<8x1x128xf32>
    tpu.vector_store %arg15[%c0_23, %c1, %c0_24], %27 {strides = array<i32>} : memref<8x2x128xf32, #tpu.memory_space<vmem>>, vector<8x1x128xf32>,
    %c0_25 = arith.constant 0 : index
    %c0_26 = arith.constant 0 : index
    %28 = vector.load %arg1[%c0_25, %c0_26] : memref<2x32xf32, #tpu.memory_space<vmem>>, vector<2x32xf32>
    %c0_27 = arith.constant 0 : index
    %c0_28 = arith.constant 0 : index
    %29 = vector.load %arg2[%c0_27, %c0_28] : memref<2x32xf32, #tpu.memory_space<vmem>>, vector<2x32xf32>
    %c0_29 = arith.constant 0 : index
    %c0_30 = arith.constant 0 : index
    %c0_31 = arith.constant 0 : index
    %30 = vector.load %arg15[%c0_29, %c0_30, %c0_31] : memref<8x2x128xf32, #tpu.memory_space<vmem>>, vector<1x2x128xf32>
    %31 = vector.shape_cast %30 : vector<1x2x128xf32> to vector<2x128xf32>
    %cst_32 = arith.constant dense<0.000000e+00> : vector<2x128xf32>
    %32 = tpu.matmul %28, %1, %cst_32 {dimension_numbers = #tpu.dot_dimension_numbers<[1], [0], [0], [1], [0, 0, 1, 1], [], []>} : vector<2x32xf32>, vector<32x128xf32>, vector<2x128xf32> -> vector<2x128xf32>
    %33 = arith.addf %31, %32 : vector<2x128xf32>
    %34 = math.tanh %33 : vector<2x128xf32>
    %35 = arith.mulf %34, %11 : vector<2x128xf32>
    %36 = arith.addf %35, %14 : vector<2x128xf32>
    %37 = vector.extract_strided_slice %36 {offsets = [0, 0], sizes = [2, 32], strides = [1, 1]} : vector<2x128xf32> to vector<2x32xf32>
    %38 = vector.extract_strided_slice %36 {offsets = [0, 32], sizes = [2, 32], strides = [1, 1]} : vector<2x128xf32> to vector<2x32xf32>
    %39 = vector.extract_strided_slice %36 {offsets = [0, 64], sizes = [2, 32], strides = [1, 1]} : vector<2x128xf32> to vector<2x32xf32>
    %40 = vector.extract_strided_slice %36 {offsets = [0, 96], sizes = [2, 32], strides = [1, 1]} : vector<2x128xf32> to vector<2x32xf32>
    %41 = arith.mulf %38, %29 : vector<2x32xf32>
    %42 = arith.mulf %37, %39 : vector<2x32xf32>
    %43 = arith.addf %41, %42 : vector<2x32xf32>
    %44 = math.tanh %43 : vector<2x32xf32>
    %45 = arith.mulf %40, %44 : vector<2x32xf32>
    %c1_33 = arith.constant 1 : index
    %c0_34 = arith.constant 0 : index
    %c0_35 = arith.constant 0 : index
    %46 = vector.load %arg15[%c1_33, %c0_34, %c0_35] : memref<8x2x128xf32, #tpu.memory_space<vmem>>, vector<1x2x128xf32>
    %47 = vector.shape_cast %46 : vector<1x2x128xf32> to vector<2x128xf32>
    %cst_36 = arith.constant dense<0.000000e+00> : vector<2x128xf32>
    %48 = tpu.matmul %45, %1, %cst_36 {dimension_numbers = #tpu.dot_dimension_numbers<[1], [0], [0], [1], [0, 0, 1, 1], [], []>} : vector<2x32xf32>, vector<32x128xf32>, vector<2x128xf32> -> vector<2x128xf32>
    %49 = arith.addf %47, %48 : vector<2x128xf32>
    %50 = math.tanh %49 : vector<2x128xf32>
    %51 = arith.mulf %50, %11 : vector<2x128xf32>
    %52 = arith.addf %51, %14 : vector<2x128xf32>
    %53 = vector.extract_strided_slice %52 {offsets = [0, 0], sizes = [2, 32], strides = [1, 1]} : vector<2x128xf32> to vector<2x32xf32>
    %54 = vector.extract_strided_slice %52 {offsets = [0, 32], sizes = [2, 32], strides = [1, 1]} : vector<2x128xf32> to vector<2x32xf32>
    %55 = vector.extract_strided_slice %52 {offsets = [0, 64], sizes = [2, 32], strides = [1, 1]} : vector<2x128xf32> to vector<2x32xf32>
    %56 = vector.extract_strided_slice %52 {offsets = [0, 96], sizes = [2, 32], strides = [1, 1]} : vector<2x128xf32> to vector<2x32xf32>
    %57 = arith.mulf %54, %43 : vector<2x32xf32>
    %58 = arith.mulf %53, %55 : vector<2x32xf32>
    %59 = arith.addf %57, %58 : vector<2x32xf32>
    %60 = math.tanh %59 : vector<2x32xf32>
    %61 = arith.mulf %56, %60 : vector<2x32xf32>
    %c2 = arith.constant 2 : index
    %c0_37 = arith.constant 0 : index
    %c0_38 = arith.constant 0 : index
    %62 = vector.load %arg15[%c2, %c0_37, %c0_38] : memref<8x2x128xf32, #tpu.memory_space<vmem>>, vector<1x2x128xf32>
    %63 = vector.shape_cast %62 : vector<1x2x128xf32> to vector<2x128xf32>
    %cst_39 = arith.constant dense<0.000000e+00> : vector<2x128xf32>
    %64 = tpu.matmul %61, %1, %cst_39 {dimension_numbers = #tpu.dot_dimension_numbers<[1], [0], [0], [1], [0, 0, 1, 1], [], []>} : vector<2x32xf32>, vector<32x128xf32>, vector<2x128xf32> -> vector<2x128xf32>
    %65 = arith.addf %63, %64 : vector<2x128xf32>
    %66 = math.tanh %65 : vector<2x128xf32>
    %67 = arith.mulf %66, %11 : vector<2x128xf32>
    %68 = arith.addf %67, %14 : vector<2x128xf32>
    %69 = vector.extract_strided_slice %68 {offsets = [0, 0], sizes = [2, 32], strides = [1, 1]} : vector<2x128xf32> to vector<2x32xf32>
    %70 = vector.extract_strided_slice %68 {offsets = [0, 32], sizes = [2, 32], strides = [1, 1]} : vector<2x128xf32> to vector<2x32xf32>
    %71 = vector.extract_strided_slice %68 {offsets = [0, 64], sizes = [2, 32], strides = [1, 1]} : vector<2x128xf32> to vector<2x32xf32>
    %72 = vector.extract_strided_slice %68 {offsets = [0, 96], sizes = [2, 32], strides = [1, 1]} : vector<2x128xf32> to vector<2x32xf32>
    %73 = arith.mulf %70, %59 : vector<2x32xf32>
    %74 = arith.mulf %69, %71 : vector<2x32xf32>
    %75 = arith.addf %73, %74 : vector<2x32xf32>
    %76 = math.tanh %75 : vector<2x32xf32>
    %77 = arith.mulf %72, %76 : vector<2x32xf32>
    %c3 = arith.constant 3 : index
    %c0_40 = arith.constant 0 : index
    %c0_41 = arith.constant 0 : index
    %78 = vector.load %arg15[%c3, %c0_40, %c0_41] : memref<8x2x128xf32, #tpu.memory_space<vmem>>, vector<1x2x128xf32>
    %79 = vector.shape_cast %78 : vector<1x2x128xf32> to vector<2x128xf32>
    %cst_42 = arith.constant dense<0.000000e+00> : vector<2x128xf32>
    %80 = tpu.matmul %77, %1, %cst_42 {dimension_numbers = #tpu.dot_dimension_numbers<[1], [0], [0], [1], [0, 0, 1, 1], [], []>} : vector<2x32xf32>, vector<32x128xf32>, vector<2x128xf32> -> vector<2x128xf32>
    %81 = arith.addf %79, %80 : vector<2x128xf32>
    %82 = math.tanh %81 : vector<2x128xf32>
    %83 = arith.mulf %82, %11 : vector<2x128xf32>
    %84 = arith.addf %83, %14 : vector<2x128xf32>
    %85 = vector.extract_strided_slice %84 {offsets = [0, 0], sizes = [2, 32], strides = [1, 1]} : vector<2x128xf32> to vector<2x32xf32>
    %86 = vector.extract_strided_slice %84 {offsets = [0, 32], sizes = [2, 32], strides = [1, 1]} : vector<2x128xf32> to vector<2x32xf32>
    %87 = vector.extract_strided_slice %84 {offsets = [0, 64], sizes = [2, 32], strides = [1, 1]} : vector<2x128xf32> to vector<2x32xf32>
    %88 = vector.extract_strided_slice %84 {offsets = [0, 96], sizes = [2, 32], strides = [1, 1]} : vector<2x128xf32> to vector<2x32xf32>
    %89 = arith.mulf %86, %75 : vector<2x32xf32>
    %90 = arith.mulf %85, %87 : vector<2x32xf32>
    %91 = arith.addf %89, %90 : vector<2x32xf32>
    %92 = math.tanh %91 : vector<2x32xf32>
    %93 = arith.mulf %88, %92 : vector<2x32xf32>
    %c4 = arith.constant 4 : index
    %c0_43 = arith.constant 0 : index
    %c0_44 = arith.constant 0 : index
    %94 = vector.load %arg15[%c4, %c0_43, %c0_44] : memref<8x2x128xf32, #tpu.memory_space<vmem>>, vector<1x2x128xf32>
    %95 = vector.shape_cast %94 : vector<1x2x128xf32> to vector<2x128xf32>
    %cst_45 = arith.constant dense<0.000000e+00> : vector<2x128xf32>
    %96 = tpu.matmul %93, %1, %cst_45 {dimension_numbers = #tpu.dot_dimension_numbers<[1], [0], [0], [1], [0, 0, 1, 1], [], []>} : vector<2x32xf32>, vector<32x128xf32>, vector<2x128xf32> -> vector<2x128xf32>
    %97 = arith.addf %95, %96 : vector<2x128xf32>
    %98 = math.tanh %97 : vector<2x128xf32>
    %99 = arith.mulf %98, %11 : vector<2x128xf32>
    %100 = arith.addf %99, %14 : vector<2x128xf32>
    %101 = vector.extract_strided_slice %100 {offsets = [0, 0], sizes = [2, 32], strides = [1, 1]} : vector<2x128xf32> to vector<2x32xf32>
    %102 = vector.extract_strided_slice %100 {offsets = [0, 32], sizes = [2, 32], strides = [1, 1]} : vector<2x128xf32> to vector<2x32xf32>
    %103 = vector.extract_strided_slice %100 {offsets = [0, 64], sizes = [2, 32], strides = [1, 1]} : vector<2x128xf32> to vector<2x32xf32>
    %104 = vector.extract_strided_slice %100 {offsets = [0, 96], sizes = [2, 32], strides = [1, 1]} : vector<2x128xf32> to vector<2x32xf32>
    %105 = arith.mulf %102, %91 : vector<2x32xf32>
    %106 = arith.mulf %101, %103 : vector<2x32xf32>
    %107 = arith.addf %105, %106 : vector<2x32xf32>
    %108 = math.tanh %107 : vector<2x32xf32>
    %109 = arith.mulf %104, %108 : vector<2x32xf32>
    %c5 = arith.constant 5 : index
    %c0_46 = arith.constant 0 : index
    %c0_47 = arith.constant 0 : index
    %110 = vector.load %arg15[%c5, %c0_46, %c0_47] : memref<8x2x128xf32, #tpu.memory_space<vmem>>, vector<1x2x128xf32>
    %111 = vector.shape_cast %110 : vector<1x2x128xf32> to vector<2x128xf32>
    %cst_48 = arith.constant dense<0.000000e+00> : vector<2x128xf32>
    %112 = tpu.matmul %109, %1, %cst_48 {dimension_numbers = #tpu.dot_dimension_numbers<[1], [0], [0], [1], [0, 0, 1, 1], [], []>} : vector<2x32xf32>, vector<32x128xf32>, vector<2x128xf32> -> vector<2x128xf32>
    %113 = arith.addf %111, %112 : vector<2x128xf32>
    %114 = math.tanh %113 : vector<2x128xf32>
    %115 = arith.mulf %114, %11 : vector<2x128xf32>
    %116 = arith.addf %115, %14 : vector<2x128xf32>
    %117 = vector.extract_strided_slice %116 {offsets = [0, 0], sizes = [2, 32], strides = [1, 1]} : vector<2x128xf32> to vector<2x32xf32>
    %118 = vector.extract_strided_slice %116 {offsets = [0, 32], sizes = [2, 32], strides = [1, 1]} : vector<2x128xf32> to vector<2x32xf32>
    %119 = vector.extract_strided_slice %116 {offsets = [0, 64], sizes = [2, 32], strides = [1, 1]} : vector<2x128xf32> to vector<2x32xf32>
    %120 = vector.extract_strided_slice %116 {offsets = [0, 96], sizes = [2, 32], strides = [1, 1]} : vector<2x128xf32> to vector<2x32xf32>
    %121 = arith.mulf %118, %107 : vector<2x32xf32>
    %122 = arith.mulf %117, %119 : vector<2x32xf32>
    %123 = arith.addf %121, %122 : vector<2x32xf32>
    %124 = math.tanh %123 : vector<2x32xf32>
    %125 = arith.mulf %120, %124 : vector<2x32xf32>
    %c6 = arith.constant 6 : index
    %c0_49 = arith.constant 0 : index
    %c0_50 = arith.constant 0 : index
    %126 = vector.load %arg15[%c6, %c0_49, %c0_50] : memref<8x2x128xf32, #tpu.memory_space<vmem>>, vector<1x2x128xf32>
    %127 = vector.shape_cast %126 : vector<1x2x128xf32> to vector<2x128xf32>
    %cst_51 = arith.constant dense<0.000000e+00> : vector<2x128xf32>
    %128 = tpu.matmul %125, %1, %cst_51 {dimension_numbers = #tpu.dot_dimension_numbers<[1], [0], [0], [1], [0, 0, 1, 1], [], []>} : vector<2x32xf32>, vector<32x128xf32>, vector<2x128xf32> -> vector<2x128xf32>
    %129 = arith.addf %127, %128 : vector<2x128xf32>
    %130 = math.tanh %129 : vector<2x128xf32>
    %131 = arith.mulf %130, %11 : vector<2x128xf32>
    %132 = arith.addf %131, %14 : vector<2x128xf32>
    %133 = vector.extract_strided_slice %132 {offsets = [0, 0], sizes = [2, 32], strides = [1, 1]} : vector<2x128xf32> to vector<2x32xf32>
    %134 = vector.extract_strided_slice %132 {offsets = [0, 32], sizes = [2, 32], strides = [1, 1]} : vector<2x128xf32> to vector<2x32xf32>
    %135 = vector.extract_strided_slice %132 {offsets = [0, 64], sizes = [2, 32], strides = [1, 1]} : vector<2x128xf32> to vector<2x32xf32>
    %136 = vector.extract_strided_slice %132 {offsets = [0, 96], sizes = [2, 32], strides = [1, 1]} : vector<2x128xf32> to vector<2x32xf32>
    %137 = arith.mulf %134, %123 : vector<2x32xf32>
    %138 = arith.mulf %133, %135 : vector<2x32xf32>
    %139 = arith.addf %137, %138 : vector<2x32xf32>
    %140 = math.tanh %139 : vector<2x32xf32>
    %141 = arith.mulf %136, %140 : vector<2x32xf32>
    %c7 = arith.constant 7 : index
    %c0_52 = arith.constant 0 : index
    %c0_53 = arith.constant 0 : index
    %142 = vector.load %arg15[%c7, %c0_52, %c0_53] : memref<8x2x128xf32, #tpu.memory_space<vmem>>, vector<1x2x128xf32>
    %143 = vector.shape_cast %142 : vector<1x2x128xf32> to vector<2x128xf32>
    %cst_54 = arith.constant dense<0.000000e+00> : vector<2x128xf32>
    %144 = tpu.matmul %141, %1, %cst_54 {dimension_numbers = #tpu.dot_dimension_numbers<[1], [0], [0], [1], [0, 0, 1, 1], [], []>} : vector<2x32xf32>, vector<32x128xf32>, vector<2x128xf32> -> vector<2x128xf32>
    %145 = arith.addf %143, %144 : vector<2x128xf32>
    %146 = math.tanh %145 : vector<2x128xf32>
    %147 = arith.mulf %146, %11 : vector<2x128xf32>
    %148 = arith.addf %147, %14 : vector<2x128xf32>
    %149 = vector.extract_strided_slice %148 {offsets = [0, 0], sizes = [2, 32], strides = [1, 1]} : vector<2x128xf32> to vector<2x32xf32>
    %150 = vector.extract_strided_slice %148 {offsets = [0, 32], sizes = [2, 32], strides = [1, 1]} : vector<2x128xf32> to vector<2x32xf32>
    %151 = vector.extract_strided_slice %148 {offsets = [0, 64], sizes = [2, 32], strides = [1, 1]} : vector<2x128xf32> to vector<2x32xf32>
    %152 = vector.extract_strided_slice %148 {offsets = [0, 96], sizes = [2, 32], strides = [1, 1]} : vector<2x128xf32> to vector<2x32xf32>
    %153 = arith.mulf %150, %139 : vector<2x32xf32>
    %154 = arith.mulf %149, %151 : vector<2x32xf32>
    %155 = arith.addf %153, %154 : vector<2x32xf32>
    %156 = math.tanh %155 : vector<2x32xf32>
    %157 = arith.mulf %152, %156 : vector<2x32xf32>
    %c0_55 = arith.constant 0 : index
    %c0_56 = arith.constant 0 : index
    %158 = vector.load %arg13[%c0_55, %c0_56] : memref<2x32xf32, #tpu.memory_space<vmem>>, vector<2x32xf32>
    tpu.vector_store %arg13[%c0_55, %c0_56], %157 {strides = array<i32>} : memref<2x32xf32, #tpu.memory_space<vmem>>, vector<2x32xf32>,
    %c0_57 = arith.constant 0 : index
    %c0_58 = arith.constant 0 : index
    %159 = vector.load %arg14[%c0_57, %c0_58] : memref<2x32xf32, #tpu.memory_space<vmem>>, vector<2x32xf32>
    tpu.vector_store %arg14[%c0_57, %c0_58], %155 {strides = array<i32>} : memref<2x32xf32, #tpu.memory_space<vmem>>, vector<2x32xf32>,
    %cst_59 = arith.constant dense<0.000000e+00> : vector<2x128xf32>
    %160 = tpu.matmul %157, %2, %cst_59 {dimension_numbers = #tpu.dot_dimension_numbers<[1], [0], [0], [1], [0, 0, 1, 1], [], []>} : vector<2x32xf32>, vector<32x128xf32>, vector<2x128xf32> -> vector<2x128xf32>
    %161 = arith.addf %160, %8 : vector<2x128xf32>
    %162 = math.tanh %161 : vector<2x128xf32>
    %163 = arith.mulf %162, %11 : vector<2x128xf32>
    %164 = arith.addf %163, %14 : vector<2x128xf32>
    %165 = vector.extract_strided_slice %164 {offsets = [0, 0], sizes = [2, 32], strides = [1, 1]} : vector<2x128xf32> to vector<2x32xf32>
    %166 = vector.extract_strided_slice %164 {offsets = [0, 32], sizes = [2, 32], strides = [1, 1]} : vector<2x128xf32> to vector<2x32xf32>
    %167 = vector.extract_strided_slice %164 {offsets = [0, 64], sizes = [2, 32], strides = [1, 1]} : vector<2x128xf32> to vector<2x32xf32>
    %168 = vector.extract_strided_slice %164 {offsets = [0, 96], sizes = [2, 32], strides = [1, 1]} : vector<2x128xf32> to vector<2x32xf32>
    %169 = arith.mulf %166, %155 : vector<2x32xf32>
    %170 = arith.mulf %165, %167 : vector<2x32xf32>
    %171 = arith.addf %169, %170 : vector<2x32xf32>
    %172 = math.tanh %171 : vector<2x32xf32>
    %173 = arith.mulf %168, %172 : vector<2x32xf32>
    %cst_60 = arith.constant dense<0.000000e+00> : vector<2x128xf32>
    %174 = tpu.matmul %173, %2, %cst_60 {dimension_numbers = #tpu.dot_dimension_numbers<[1], [0], [0], [1], [0, 0, 1, 1], [], []>} : vector<2x32xf32>, vector<32x128xf32>, vector<2x128xf32> -> vector<2x128xf32>
    %175 = arith.addf %174, %8 : vector<2x128xf32>
    %176 = math.tanh %175 : vector<2x128xf32>
    %177 = arith.mulf %176, %11 : vector<2x128xf32>
    %178 = arith.addf %177, %14 : vector<2x128xf32>
    %179 = vector.extract_strided_slice %178 {offsets = [0, 0], sizes = [2, 32], strides = [1, 1]} : vector<2x128xf32> to vector<2x32xf32>
    %180 = vector.extract_strided_slice %178 {offsets = [0, 32], sizes = [2, 32], strides = [1, 1]} : vector<2x128xf32> to vector<2x32xf32>
    %181 = vector.extract_strided_slice %178 {offsets = [0, 64], sizes = [2, 32], strides = [1, 1]} : vector<2x128xf32> to vector<2x32xf32>
    %182 = vector.extract_strided_slice %178 {offsets = [0, 96], sizes = [2, 32], strides = [1, 1]} : vector<2x128xf32> to vector<2x32xf32>
    %183 = arith.mulf %180, %171 : vector<2x32xf32>
    %184 = arith.mulf %179, %181 : vector<2x32xf32>
    %185 = arith.addf %183, %184 : vector<2x32xf32>
    %186 = math.tanh %185 : vector<2x32xf32>
    %187 = arith.mulf %182, %186 : vector<2x32xf32>
    %cst_61 = arith.constant dense<0.000000e+00> : vector<2x128xf32>
    %188 = tpu.matmul %187, %2, %cst_61 {dimension_numbers = #tpu.dot_dimension_numbers<[1], [0], [0], [1], [0, 0, 1, 1], [], []>} : vector<2x32xf32>, vector<32x128xf32>, vector<2x128xf32> -> vector<2x128xf32>
    %189 = arith.addf %188, %8 : vector<2x128xf32>
    %190 = math.tanh %189 : vector<2x128xf32>
    %191 = arith.mulf %190, %11 : vector<2x128xf32>
    %192 = arith.addf %191, %14 : vector<2x128xf32>
    %193 = vector.extract_strided_slice %192 {offsets = [0, 0], sizes = [2, 32], strides = [1, 1]} : vector<2x128xf32> to vector<2x32xf32>
    %194 = vector.extract_strided_slice %192 {offsets = [0, 32], sizes = [2, 32], strides = [1, 1]} : vector<2x128xf32> to vector<2x32xf32>
    %195 = vector.extract_strided_slice %192 {offsets = [0, 64], sizes = [2, 32], strides = [1, 1]} : vector<2x128xf32> to vector<2x32xf32>
    %196 = vector.extract_strided_slice %192 {offsets = [0, 96], sizes = [2, 32], strides = [1, 1]} : vector<2x128xf32> to vector<2x32xf32>
    %197 = arith.mulf %194, %185 : vector<2x32xf32>
    %198 = arith.mulf %193, %195 : vector<2x32xf32>
    %199 = arith.addf %197, %198 : vector<2x32xf32>
    %200 = math.tanh %199 : vector<2x32xf32>
    %201 = arith.mulf %196, %200 : vector<2x32xf32>
    %cst_62 = arith.constant dense<0.000000e+00> : vector<2x128xf32>
    %202 = tpu.matmul %201, %2, %cst_62 {dimension_numbers = #tpu.dot_dimension_numbers<[1], [0], [0], [1], [0, 0, 1, 1], [], []>} : vector<2x32xf32>, vector<32x128xf32>, vector<2x128xf32> -> vector<2x128xf32>
    %203 = arith.addf %202, %8 : vector<2x128xf32>
    %204 = math.tanh %203 : vector<2x128xf32>
    %205 = arith.mulf %204, %11 : vector<2x128xf32>
    %206 = arith.addf %205, %14 : vector<2x128xf32>
    %207 = vector.extract_strided_slice %206 {offsets = [0, 0], sizes = [2, 32], strides = [1, 1]} : vector<2x128xf32> to vector<2x32xf32>
    %208 = vector.extract_strided_slice %206 {offsets = [0, 32], sizes = [2, 32], strides = [1, 1]} : vector<2x128xf32> to vector<2x32xf32>
    %209 = vector.extract_strided_slice %206 {offsets = [0, 64], sizes = [2, 32], strides = [1, 1]} : vector<2x128xf32> to vector<2x32xf32>
    %210 = vector.extract_strided_slice %206 {offsets = [0, 96], sizes = [2, 32], strides = [1, 1]} : vector<2x128xf32> to vector<2x32xf32>
    %211 = arith.mulf %208, %199 : vector<2x32xf32>
    %212 = arith.mulf %207, %209 : vector<2x32xf32>
    %213 = arith.addf %211, %212 : vector<2x32xf32>
    %214 = math.tanh %213 : vector<2x32xf32>
    %215 = arith.mulf %210, %214 : vector<2x32xf32>
    %cst_63 = arith.constant dense<0.000000e+00> : vector<2x128xf32>
    %216 = tpu.matmul %215, %2, %cst_63 {dimension_numbers = #tpu.dot_dimension_numbers<[1], [0], [0], [1], [0, 0, 1, 1], [], []>} : vector<2x32xf32>, vector<32x128xf32>, vector<2x128xf32> -> vector<2x128xf32>
    %217 = arith.addf %216, %8 : vector<2x128xf32>
    %218 = math.tanh %217 : vector<2x128xf32>
    %219 = arith.mulf %218, %11 : vector<2x128xf32>
    %220 = arith.addf %219, %14 : vector<2x128xf32>
    %221 = vector.extract_strided_slice %220 {offsets = [0, 0], sizes = [2, 32], strides = [1, 1]} : vector<2x128xf32> to vector<2x32xf32>
    %222 = vector.extract_strided_slice %220 {offsets = [0, 32], sizes = [2, 32], strides = [1, 1]} : vector<2x128xf32> to vector<2x32xf32>
    %223 = vector.extract_strided_slice %220 {offsets = [0, 64], sizes = [2, 32], strides = [1, 1]} : vector<2x128xf32> to vector<2x32xf32>
    %224 = vector.extract_strided_slice %220 {offsets = [0, 96], sizes = [2, 32], strides = [1, 1]} : vector<2x128xf32> to vector<2x32xf32>
    %225 = arith.mulf %222, %213 : vector<2x32xf32>
    %226 = arith.mulf %221, %223 : vector<2x32xf32>
    %227 = arith.addf %225, %226 : vector<2x32xf32>
    %228 = math.tanh %227 : vector<2x32xf32>
    %229 = arith.mulf %224, %228 : vector<2x32xf32>
    %cst_64 = arith.constant dense<0.000000e+00> : vector<2x128xf32>
    %230 = tpu.matmul %229, %2, %cst_64 {dimension_numbers = #tpu.dot_dimension_numbers<[1], [0], [0], [1], [0, 0, 1, 1], [], []>} : vector<2x32xf32>, vector<32x128xf32>, vector<2x128xf32> -> vector<2x128xf32>
    %231 = arith.addf %230, %8 : vector<2x128xf32>
    %232 = math.tanh %231 : vector<2x128xf32>
    %233 = arith.mulf %232, %11 : vector<2x128xf32>
    %234 = arith.addf %233, %14 : vector<2x128xf32>
    %235 = vector.extract_strided_slice %234 {offsets = [0, 0], sizes = [2, 32], strides = [1, 1]} : vector<2x128xf32> to vector<2x32xf32>
    %236 = vector.extract_strided_slice %234 {offsets = [0, 32], sizes = [2, 32], strides = [1, 1]} : vector<2x128xf32> to vector<2x32xf32>
    %237 = vector.extract_strided_slice %234 {offsets = [0, 64], sizes = [2, 32], strides = [1, 1]} : vector<2x128xf32> to vector<2x32xf32>
    %238 = vector.extract_strided_slice %234 {offsets = [0, 96], sizes = [2, 32], strides = [1, 1]} : vector<2x128xf32> to vector<2x32xf32>
    %239 = arith.mulf %236, %227 : vector<2x32xf32>
    %240 = arith.mulf %235, %237 : vector<2x32xf32>
    %241 = arith.addf %239, %240 : vector<2x32xf32>
    %242 = math.tanh %241 : vector<2x32xf32>
    %243 = arith.mulf %238, %242 : vector<2x32xf32>
    %cst_65 = arith.constant dense<0.000000e+00> : vector<2x128xf32>
    %244 = tpu.matmul %243, %2, %cst_65 {dimension_numbers = #tpu.dot_dimension_numbers<[1], [0], [0], [1], [0, 0, 1, 1], [], []>} : vector<2x32xf32>, vector<32x128xf32>, vector<2x128xf32> -> vector<2x128xf32>
    %245 = arith.addf %244, %8 : vector<2x128xf32>
    %246 = math.tanh %245 : vector<2x128xf32>
    %247 = arith.mulf %246, %11 : vector<2x128xf32>
    %248 = arith.addf %247, %14 : vector<2x128xf32>
    %249 = vector.extract_strided_slice %248 {offsets = [0, 0], sizes = [2, 32], strides = [1, 1]} : vector<2x128xf32> to vector<2x32xf32>
    %250 = vector.extract_strided_slice %248 {offsets = [0, 32], sizes = [2, 32], strides = [1, 1]} : vector<2x128xf32> to vector<2x32xf32>
    %251 = vector.extract_strided_slice %248 {offsets = [0, 64], sizes = [2, 32], strides = [1, 1]} : vector<2x128xf32> to vector<2x32xf32>
    %252 = vector.extract_strided_slice %248 {offsets = [0, 96], sizes = [2, 32], strides = [1, 1]} : vector<2x128xf32> to vector<2x32xf32>
    %253 = arith.mulf %250, %241 : vector<2x32xf32>
    %254 = arith.mulf %249, %251 : vector<2x32xf32>
    %255 = arith.addf %253, %254 : vector<2x32xf32>
    %256 = math.tanh %255 : vector<2x32xf32>
    %257 = arith.mulf %252, %256 : vector<2x32xf32>
    %cst_66 = arith.constant dense<0.000000e+00> : vector<2x128xf32>
    %258 = tpu.matmul %257, %2, %cst_66 {dimension_numbers = #tpu.dot_dimension_numbers<[1], [0], [0], [1], [0, 0, 1, 1], [], []>} : vector<2x32xf32>, vector<32x128xf32>, vector<2x128xf32> -> vector<2x128xf32>
    %259 = arith.addf %258, %8 : vector<2x128xf32>
    %260 = math.tanh %259 : vector<2x128xf32>
    %261 = arith.mulf %260, %11 : vector<2x128xf32>
    %262 = arith.addf %261, %14 : vector<2x128xf32>
    %263 = vector.extract_strided_slice %262 {offsets = [0, 0], sizes = [2, 32], strides = [1, 1]} : vector<2x128xf32> to vector<2x32xf32>
    %264 = vector.extract_strided_slice %262 {offsets = [0, 32], sizes = [2, 32], strides = [1, 1]} : vector<2x128xf32> to vector<2x32xf32>
    %265 = vector.extract_strided_slice %262 {offsets = [0, 64], sizes = [2, 32], strides = [1, 1]} : vector<2x128xf32> to vector<2x32xf32>
    %266 = vector.extract_strided_slice %262 {offsets = [0, 96], sizes = [2, 32], strides = [1, 1]} : vector<2x128xf32> to vector<2x32xf32>
    %267 = arith.mulf %264, %255 : vector<2x32xf32>
    %268 = arith.mulf %263, %265 : vector<2x32xf32>
    %269 = arith.addf %267, %268 : vector<2x32xf32>
    %270 = math.tanh %269 : vector<2x32xf32>
    %271 = arith.mulf %266, %270 : vector<2x32xf32>
    %c0_67 = arith.constant 0 : index
    %c0_68 = arith.constant 0 : index
    %c0_69 = arith.constant 0 : index
    %272 = vector.load %arg16[%c0_67, %c0_68, %c0_69] : memref<2x8x32xf32, #tpu.memory_space<vmem>>, vector<2x1x32xf32>
    %273 = vector.shape_cast %272 : vector<2x1x32xf32> to vector<2x32xf32>
    %274 = vector.shape_cast %173 : vector<2x32xf32> to vector<2x1x32xf32>
    tpu.vector_store %arg16[%c0_67, %c0_68, %c0_69], %274 {strides = array<i32>} : memref<2x8x32xf32, #tpu.memory_space<vmem>>, vector<2x1x32xf32>,
    %c0_70 = arith.constant 0 : index
    %c1_71 = arith.constant 1 : index
    %c0_72 = arith.constant 0 : index
    %275 = vector.load %arg16[%c0_70, %c1_71, %c0_72] : memref<2x8x32xf32, #tpu.memory_space<vmem>>, vector<2x1x32xf32>
    %276 = vector.shape_cast %275 : vector<2x1x32xf32> to vector<2x32xf32>
    %277 = vector.shape_cast %187 : vector<2x32xf32> to vector<2x1x32xf32>
    tpu.vector_store %arg16[%c0_70, %c1_71, %c0_72], %277 {strides = array<i32>} : memref<2x8x32xf32, #tpu.memory_space<vmem>>, vector<2x1x32xf32>,
    %c0_73 = arith.constant 0 : index
    %c2_74 = arith.constant 2 : index
    %c0_75 = arith.constant 0 : index
    %278 = vector.load %arg16[%c0_73, %c2_74, %c0_75] : memref<2x8x32xf32, #tpu.memory_space<vmem>>, vector<2x1x32xf32>
    %279 = vector.shape_cast %278 : vector<2x1x32xf32> to vector<2x32xf32>
    %280 = vector.shape_cast %201 : vector<2x32xf32> to vector<2x1x32xf32>
    tpu.vector_store %arg16[%c0_73, %c2_74, %c0_75], %280 {strides = array<i32>} : memref<2x8x32xf32, #tpu.memory_space<vmem>>, vector<2x1x32xf32>,
    %c0_76 = arith.constant 0 : index
    %c3_77 = arith.constant 3 : index
    %c0_78 = arith.constant 0 : index
    %281 = vector.load %arg16[%c0_76, %c3_77, %c0_78] : memref<2x8x32xf32, #tpu.memory_space<vmem>>, vector<2x1x32xf32>
    %282 = vector.shape_cast %281 : vector<2x1x32xf32> to vector<2x32xf32>
    %283 = vector.shape_cast %215 : vector<2x32xf32> to vector<2x1x32xf32>
    tpu.vector_store %arg16[%c0_76, %c3_77, %c0_78], %283 {strides = array<i32>} : memref<2x8x32xf32, #tpu.memory_space<vmem>>, vector<2x1x32xf32>,
    %c0_79 = arith.constant 0 : index
    %c4_80 = arith.constant 4 : index
    %c0_81 = arith.constant 0 : index
    %284 = vector.load %arg16[%c0_79, %c4_80, %c0_81] : memref<2x8x32xf32, #tpu.memory_space<vmem>>, vector<2x1x32xf32>
    %285 = vector.shape_cast %284 : vector<2x1x32xf32> to vector<2x32xf32>
    %286 = vector.shape_cast %229 : vector<2x32xf32> to vector<2x1x32xf32>
    tpu.vector_store %arg16[%c0_79, %c4_80, %c0_81], %286 {strides = array<i32>} : memref<2x8x32xf32, #tpu.memory_space<vmem>>, vector<2x1x32xf32>,
    %c0_82 = arith.constant 0 : index
    %c5_83 = arith.constant 5 : index
    %c0_84 = arith.constant 0 : index
    %287 = vector.load %arg16[%c0_82, %c5_83, %c0_84] : memref<2x8x32xf32, #tpu.memory_space<vmem>>, vector<2x1x32xf32>
    %288 = vector.shape_cast %287 : vector<2x1x32xf32> to vector<2x32xf32>
    %289 = vector.shape_cast %243 : vector<2x32xf32> to vector<2x1x32xf32>
    tpu.vector_store %arg16[%c0_82, %c5_83, %c0_84], %289 {strides = array<i32>} : memref<2x8x32xf32, #tpu.memory_space<vmem>>, vector<2x1x32xf32>,
    %c0_85 = arith.constant 0 : index
    %c6_86 = arith.constant 6 : index
    %c0_87 = arith.constant 0 : index
    %290 = vector.load %arg16[%c0_85, %c6_86, %c0_87] : memref<2x8x32xf32, #tpu.memory_space<vmem>>, vector<2x1x32xf32>
    %291 = vector.shape_cast %290 : vector<2x1x32xf32> to vector<2x32xf32>
    %292 = vector.shape_cast %257 : vector<2x32xf32> to vector<2x1x32xf32>
    tpu.vector_store %arg16[%c0_85, %c6_86, %c0_87], %292 {strides = array<i32>} : memref<2x8x32xf32, #tpu.memory_space<vmem>>, vector<2x1x32xf32>,
    %c0_88 = arith.constant 0 : index
    %c7_89 = arith.constant 7 : index
    %c0_90 = arith.constant 0 : index
    %293 = vector.load %arg16[%c0_88, %c7_89, %c0_90] : memref<2x8x32xf32, #tpu.memory_space<vmem>>, vector<2x1x32xf32>
    %294 = vector.shape_cast %293 : vector<2x1x32xf32> to vector<2x32xf32>
    %295 = vector.shape_cast %271 : vector<2x32xf32> to vector<2x1x32xf32>
    tpu.vector_store %arg16[%c0_88, %c7_89, %c0_90], %295 {strides = array<i32>} : memref<2x8x32xf32, #tpu.memory_space<vmem>>, vector<2x1x32xf32>,
    %c0_91 = arith.constant 0 : index
    %c0_92 = arith.constant 0 : index
    %c0_93 = arith.constant 0 : index
    %296 = vector.load %arg16[%c0_91, %c0_92, %c0_93] : memref<2x8x32xf32, #tpu.memory_space<vmem>>, vector<2x8x32xf32>
    %297 = vector.shape_cast %296 : vector<2x8x32xf32> to vector<16x32xf32>
    %cst_94 = arith.constant dense<0.000000e+00> : vector<16x16xf32>
    %298 = tpu.matmul %297, %4, %cst_94 {dimension_numbers = #tpu.dot_dimension_numbers<[1], [0], [0], [1], [0, 0, 1, 1], [], []>} : vector<16x32xf32>, vector<32x16xf32>, vector<16x16xf32> -> vector<16x16xf32>
    %299 = vector.broadcast %5 : vector<1x16xf32> to vector<16x16xf32>
    %300 = arith.addf %298, %299 : vector<16x16xf32>
    %301 = vector.shape_cast %300 : vector<16x16xf32> to vector<2x8x16xf32>
    %c0_95 = arith.constant 0 : index
    %c0_96 = arith.constant 0 : index
    %c0_97 = arith.constant 0 : index
    %302 = vector.load %arg12[%c0_95, %c0_96, %c0_97] : memref<2x8x16xf32, #tpu.memory_space<vmem>>, vector<2x8x16xf32>
    tpu.vector_store %arg12[%c0_95, %c0_96, %c0_97], %301 {strides = array<i32>} : memref<2x8x16xf32, #tpu.memory_space<vmem>>, vector<2x8x16xf32>,
    return
  }
}

</mosaic_0001>

<bundles_post_ra>
// kernel: _forward_impl.1
= control target key start
LH: loop header
LB: loop body
LE: loop exit
PB: predicated region body
PF: predicated region fallthrough
CT: control target
= control target key end

     0   :  { %20 = vsyncpa [#allocation5], 0  ;;  %vm91_vm0 = vcmask 130048   ;;  %v2872_v4 = vmov 0.0|0.0   ;;  %vm2873_vm1 = vmmov 0   ;;  %v2874_v10 = vmov 0.0   ;;  %s3429_s0 = inlined_call_operand.vmem [shape: f32[2,8,16], index: 0, kind: input, shape index: {}]   ;;  %s3430_s1 = inlined_call_operand.vmem [shape: f32[2,32], index: 1, kind: input, shape index: {}]   ;;  %s3431_s2 = inlined_call_operand.vmem [shape: f32[2,32], index: 2, kind: input, shape index: {}]   ;;  %s3432_s3 = inlined_call_operand.vmem [shape: f32[16,128], index: 3, kind: input, shape index: {}]   ;;  %s3433_s4 = inlined_call_operand.vmem [shape: f32[32,128], index: 4, kind: input, shape index: {}]   ;;  %s3434_s5 = inlined_call_operand.vmem [shape: f32[1,128], index: 5, kind: input, shape index: {}]   ;;  %s3435_s6 = inlined_call_operand.vmem [shape: f32[32,128], index: 6, kind: input, shape index: {}]   ;;  %s3436_s7 = inlined_call_operand.vmem [shape: f32[1,128], index: 7, kind: input, shape index: {}]   ;;  %s3437_s8 = inlined_call_operand.vmem [shape: f32[32,16], index: 8, kind: input, shape index: {}]   ;;  %s3438_s9 = inlined_call_operand.vmem [shape: f32[1,16], index: 9, kind: input, shape index: {}]   ;;  %s3439_s10 = inlined_call_operand.vmem [shape: f32[1,128], index: 10, kind: input, shape index: {}]   ;;  %s3440_s11 = inlined_call_operand.vmem [shape: f32[1,128], index: 11, kind: input, shape index: {}]   ;;  %s3441_s12 = inlined_call_operand.hbm [shape: f32[2,8,16], index: 12, kind: output, shape index: {0}]   ;;  %s3442_s13 = inlined_call_operand.hbm [shape: f32[2,32], index: 13, kind: output, shape index: {1}]   ;;  %s3443_s14 = inlined_call_operand.hbm [shape: f32[2,32], index: 14, kind: output, shape index: {2}]  }
   0x1   :  { %v46_v0 = vld [vmem:[%s3432_s3] sm:$0xff]  ;;  %v47_v1 = vld [vmem:[%s3432_s3 + $0x8] sm:$0xff]  ;;  %2622 = vmatprep.subr.bf16.mxu1 %v2872_v4  ;;  %v50_v8 = vld [vmem:[%s3433_s4 + $0x10] sm:$0xff]  ;;  %2439 = vmatprep.mubr.msk.f32.mxu1 %vm2873_vm1, %v2874_v10 }
   0x2   :  { %v83_v2 = vld [vmem:[%s3429_s0] sm:$0xff]  ;;  %v2618_v3 = vpack.c.bf16 %v47_v1, %v46_v0  ;;  %v49_v6 = vld [vmem:[%s3433_s4 + $0x8] sm:$0xff]  ;;  %v51_v9 = vld [vmem:[%s3433_s4 + $0x18] sm:$0xff] }
   0x3   :  { %2428 = vmatprep.mubr.msk.f32.mxu0 %vm91_vm0, %v83_v2  ;;  %v48_v5 = vld [vmem:[%s3433_s4] sm:$0xff] }
   0x4   :  { %v2976_v7 = vpack.c.bf16 %v49_v6, %v48_v5  ;;  %2619 = vmatprep.subr.bf16.mxu0 %v2618_v3 }
   0x5   :  { %21 = vsyncpa [#allocation7], 0  ;;  %2621 = vmatpush3.bf16.msra.mxu0 %v2618_v3  ;;  %v84_v11 = vld [vmem:[%s3429_s0 + $0x8] sm:$0xff]  ;;  %v2990_v12 = vpack.c.bf16 %v51_v9, %v50_v8  ;;  %v305_v13 = vld [vmem:[%s3430_s1] sm:$0x3]  ;;  %vm308_vm2 = vcmask 261120   ;;  %v178_v16 = vlaneseq }
   0x6   :  { %2624 = vmatpush3.bf16.msra.mxu1 %v2976_v7  ;;  %2628 = vmatprep.subr.bf16.mxu0 %v2872_v4  ;;  %v2875_v14 = vmov 1966171168   ;;  %v2304_v19 = vld [vmem:[%s3434_s5] ss:$0 sm:$0xff]  ;;  %s2876_s16 = smov 64   ;;  %s2877_s19 = smov 32  }
   0x7   :  { %2625 = vmatprep.subr.bf16.mxu1 %v2872_v4  ;;  %v176_v15 = vunpack.c.l.s4 %v2875_v14  ;;  %v3013_v18 = vshrl.u32 %v178_v16, 7  ;;  %v3036_v55 = vld [vmem:[%s3439_s10] ss:$0 sm:$0xff]  ;;  %vm1097_vm3 = vcmask 254976   ;;  %vm1897_vm4 = vcmask 253952  }
   0x8   :  { %2429 = vmatmul.mubr.msk.f32.vlgmr.msra.gmra.mrb[0].mxu0 %vm91_vm0, %v84_v11  ;;  %v3041_v57 = vld [vmem:[%s3440_s11] ss:$0 sm:$0xff] }
   0x9   :  { %2630 = vmatpush3.bf16.msra.mxu0 %v2976_v7  ;;  %2450 = vmatprep.mubr.msk.f32.mxu0 %vm2873_vm1, %v2874_v10  ;;  %v177_v17 = vunpack.c.0.s8 %v176_v15  ;;  %v306_v60 = vld [vmem:[%s3431_s2] sm:$0x3] }
   0xa   :  { %2627 = vmatpush3.bf16.msra.mxu1 %v2990_v12  ;;  %2631 = vmatprep.subr.bf16.mxu0 %v2872_v4 }
   0xb   :  { %2634 = vmatprep.subr.bf16.mxu1 %v2872_v4  ;;  %v3019_v20 = vsub.s32 %v177_v17, %v3013_v18 }
   0xd   :  { %2440 = vmatmul.mubr.msk.f32.vlgmr.msra.gmra.mrb[0].mxu1 %vm308_vm2, %v305_v13  ;;  %2633 = vmatpush3.bf16.msra.mxu0 %v2990_v12 }
   0xe   :  { %2636 = vmatpush3.bf16.msra.mxu1 %v2976_v7  ;;  %2461 = vmatprep.mubr.msk.f32.mxu1 %vm2873_vm1, %v2874_v10 }
   0xf   :  { %2637 = vmatprep.subr.bf16.mxu1 %v2872_v4  ;;  %2640 = vmatprep.subr.bf16.mxu0 %v2872_v4 }
  0x12   :  { %2639 = vmatpush3.bf16.msra.mxu1 %v2990_v12 }
  0x13   :  { %2646 = vmatprep.subr.bf16.mxu1 %v2872_v4 }
  0xdb   :  { %v2430_v21 = vpop.f32.mrb[0].mxu0 }
  0xdc   :  { %v170_v22 = vadd.f32 %v2430_v21, %v2304_v19  ;;  %v164_v23 = vpop.f32.mrb[1].mxu0 }
  0xdd   :  { %v165_v24 = vadd.f32 %v2304_v19, %v164_v23 }
  0xde   :  { %v240_v25 = vcombine.high %v170_v22, %v170_v22  ;;  %v247_v26 = vrot.slane %v170_v22, %v3019_v20 }
  0xdf   :  { %v174_v27 = vcombine.high %v165_v24, %v165_v24  ;;  %v181_v28 = vrot.slane %v165_v24, %v3019_v20 }
  0xe0   :  { %v378_v29 = vpop.f32.mrb[0].mxu1  ;;  %v254_v30 = vrot.slane %v240_v25, %v3019_v20  ;;  %v255_v31 = vcombine.high %v247_v26, %v247_v26  ;;  %v263_v32 = vrot.slane %v247_v26, %v3019_v20  ;;  %2311 = vst.sshfl [vmem:[#allocation2 + $0x1] sm:$0x1 pattern:$0x73625140] %v247_v26 }
  0xe1   :  { %v2441_v33 = vpop.f32.mrb[1].mxu1  ;;  %v188_v34 = vrot.slane %v174_v27, %v3019_v20  ;;  %v189_v35 = vcombine.high %v181_v28, %v181_v28  ;;  %v197_v36 = vrot.slane %v181_v28, %v3019_v20  ;;  %2307 = vst.sshfl [vmem:[#allocation2] sm:$0x1 pattern:$0x73625140] %v181_v28 }
  0xe2   :  { %v256_v37 = vcombine.high %v254_v30, %v254_v30  ;;  %v270_v38 = vrot.slane %v254_v30, %v3019_v20  ;;  %v277_v39 = vrot.slane %v255_v31, %v3019_v20  ;;  %v285_v40 = vcombine.high %v263_v32, %v263_v32  ;;  %2312 = vst.sshfl [vmem:[#allocation2 + $0x3] sm:$0x1 pattern:$0x73625140] %v255_v31 }
  0xe3   :  { %2313 = vst.sshfl [vmem:[#allocation2 + $0x9] sm:$0x1 pattern:$0x73625140] %v254_v30  ;;  %v190_v41 = vcombine.high %v188_v34, %v188_v34  ;;  %v204_v42 = vrot.slane %v188_v34, %v3019_v20  ;;  %v211_v43 = vrot.slane %v189_v35, %v3019_v20  ;;  %v219_v44 = vcombine.high %v197_v36, %v197_v36 }
  0xe4   :  { %2308 = vst.sshfl [vmem:[#allocation2 + $0x2] sm:$0x1 pattern:$0x73625140] %v189_v35  ;;  %v284_v45 = vrot.slane %v256_v37, %v3019_v20  ;;  %v286_v46 = vcombine.high %v270_v38, %v270_v38  ;;  %v287_v47 = vcombine.high %v277_v39, %v277_v39  ;;  %299 = vst [vmem:[#allocation2 + $0x5] sm:$0x1] %v285_v40 }
  0xe5   :  { %2309 = vst.sshfl [vmem:[#allocation2 + $0x8] sm:$0x1 pattern:$0x73625140] %v188_v34  ;;  %v218_v48 = vrot.slane %v190_v41, %v3019_v20  ;;  %v220_v49 = vcombine.high %v204_v42, %v204_v42  ;;  %v221_v50 = vcombine.high %v211_v43, %v211_v43  ;;  %233 = vst [vmem:[#allocation2 + $0x4] sm:$0x1] %v219_v44 }
  0xe6   :  { %2314 = vst.sshfl [vmem:[#allocation2 + $0xb] sm:$0x1 pattern:$0x73625140] %v256_v37  ;;  %v288_v51 = vcombine.high %v284_v45, %v284_v45  ;;  %300 = vst [vmem:[#allocation2 + $0x7] sm:$0x1] %v287_v47 }
  0xe7   :  { %2310 = vst.sshfl [vmem:[#allocation2 + $0xa] sm:$0x1 pattern:$0x73625140] %v190_v41  ;;  %303 = vst [vmem:[#allocation2 + $0xd] sm:$0x1] %v286_v46  ;;  %v222_v52 = vcombine.high %v218_v48, %v218_v48 }
  0xe8   :  { %234 = vst [vmem:[#allocation2 + $0x6] sm:$0x1] %v221_v50  ;;  %237 = vst [vmem:[#allocation2 + $0xc] sm:$0x1] %v220_v49  ;;  %v307_v53 = vld [vmem:[#allocation2] sm:$0x3] }
  0xe9   :  { %304 = vst [vmem:[#allocation2 + $0xf] sm:$0x1] %v288_v51  ;;  %238 = vst [vmem:[#allocation2 + $0xe] sm:$0x1] %v222_v52  ;;  %v382_v54 = vadd.f32 %v378_v29, %v307_v53 }
  0xeb   :  { %2738 = vtanh.f32 %v382_v54  ;;  %v408_v9 = vld [vmem:[#allocation2 + $0x2] sm:$0x3] }
  0xec   :  { %v506_v29 = vld [vmem:[#allocation2 + $0x4] sm:$0x3] }
  0xef   :  { %v604_v45 = vld [vmem:[#allocation2 + $0x6] sm:$0x3] }
  0xf5   :  { %v2739_v56 = vpop.eup %2738 }
  0xf6   :  { %v384_v58 = vmul.f32 %v2739_v56, %v3036_v55 }
  0xf8   :  { %v385_v59 = vadd.f32 %v3041_v57, %v384_v58 }
  0xfa   :  { %392 = vrot.lane.b32.xlu0 %v385_v59, %s2876_s16 }
  0xfe   :  { %387 = vrot.lane.b32.xlu0 %v306_v60, %s2877_s19 }
 0x16c   :  { %v393_v61 = vpop.permute.xlu0 %392 }
 0x16d   :  { %v395_v62 = vmul.f32 %v393_v61, %v385_v59 }
 0x16f   :  { %397 = vrot.lane.b32.xlu1 %v395_v62, %s2877_s19 }
 0x170   :  { %v388_v63 = vpop.permute.xlu0 %387 }
 0x171   :  { %v390_v0 = vmul.f32 %v388_v63, %v385_v59  ;;  %v702_v63 = vld [vmem:[#allocation2 + $0x8] sm:$0x3] }
 0x1e1   :  { %v398_v1 = vpop.permute.xlu1 %397 }
 0x1e2   :  { %v400_v2 = vadd.f32 %v398_v1, %v390_v0 }
 0x1e4   :  { %2740 = vtanh.f32 %v400_v2 }
 0x1ee   :  { %v2741_v3 = vpop.eup %2740 }
 0x1ef   :  { %403 = vrot.lane.b32.xlu1 %v2741_v3, %s2876_s16 }
 0x261   :  { %v404_v5 = vpop.permute.xlu1 %403 }
 0x262   :  { %v406_v6 = vmul.f32 %v404_v5, %v385_v59 }
 0x264   :  { %410 = vrot.lane.b32.xlu0 %v406_v6, %s2877_s19 }
 0x2d6   :  { %v411_v8 = vpop.permute.xlu0 %410 }
 0x2d7   :  { %2451 = vmatmul.mubr.msk.f32.vlgmr.msra.gmra.mrb[2].mxu0 %vm308_vm2, %v411_v8 }
 0x2d8   :  { %2642 = vmatpush3.bf16.msra.mxu0 %v2976_v7  ;;  %2472 = vmatprep.mubr.msk.f32.mxu0 %vm2873_vm1, %v2874_v10 }
 0x2d9   :  { %2643 = vmatprep.subr.bf16.mxu0 %v2872_v4 }
 0x2dc   :  { %2645 = vmatpush3.bf16.msra.mxu0 %v2990_v12 }
 0x2dd   :  { %2652 = vmatprep.subr.bf16.mxu0 %v2872_v4 }
 0x3aa   :  { %v480_v11 = vpop.f32.mrb[2].mxu0 }
 0x3ab   :  { %v484_v13 = vadd.f32 %v480_v11, %v408_v9  ;;  %v2452_v14 = vpop.f32.mrb[3].mxu0 }
 0x3ad   :  { %2742 = vtanh.f32 %v484_v13 }
 0x3b7   :  { %v2743_v15 = vpop.eup %2742 }
 0x3b8   :  { %v486_v16 = vmul.f32 %v2743_v15, %v3036_v55 }
 0x3ba   :  { %v487_v17 = vadd.f32 %v3041_v57, %v486_v16 }
 0x3bc   :  { %490 = vrot.lane.b32.xlu1 %v487_v17, %s2876_s16  ;;  %v488_v22 = vmul.f32 %v487_v17, %v400_v2 }
 0x42e   :  { %v491_v19 = vpop.permute.xlu1 %490 }
 0x42f   :  { %v493_v21 = vmul.f32 %v491_v19, %v487_v17 }
 0x431   :  { %495 = vrot.lane.b32.xlu0 %v493_v21, %s2877_s19  ;;  %v800_v21 = vld [vmem:[#allocation2 + $0xa] sm:$0x3] }
 0x4a3   :  { %v496_v23 = vpop.permute.xlu0 %495 }
 0x4a4   :  { %v498_v24 = vadd.f32 %v496_v23, %v488_v22 }
 0x4a6   :  { %2744 = vtanh.f32 %v498_v24 }
 0x4b0   :  { %v2745_v25 = vpop.eup %2744 }
 0x4b1   :  { %501 = vrot.lane.b32.xlu1 %v2745_v25, %s2876_s16 }
 0x523   :  { %v502_v26 = vpop.permute.xlu1 %501 }
 0x524   :  { %v504_v27 = vmul.f32 %v502_v26, %v487_v17 }
 0x526   :  { %508 = vrot.lane.b32.xlu0 %v504_v27, %s2877_s19 }
 0x598   :  { %v509_v28 = vpop.permute.xlu0 %508 }
 0x599   :  { %2462 = vmatmul.mubr.msk.f32.vlgmr.msra.gmra.mrb[2].mxu1 %vm308_vm2, %v509_v28 }
 0x59a   :  { %2648 = vmatpush3.bf16.msra.mxu1 %v2976_v7  ;;  %2483 = vmatprep.mubr.msk.f32.mxu1 %vm2873_vm1, %v2874_v10 }
 0x59b   :  { %2649 = vmatprep.subr.bf16.mxu1 %v2872_v4 }
 0x59e   :  { %2651 = vmatpush3.bf16.msra.mxu1 %v2990_v12 }
 0x59f   :  { %2658 = vmatprep.subr.bf16.mxu1 %v2872_v4 }
 0x66c   :  { %v578_v30 = vpop.f32.mrb[2].mxu1 }
 0x66d   :  { %v582_v31 = vadd.f32 %v578_v30, %v506_v29  ;;  %v2463_v32 = vpop.f32.mrb[3].mxu1 }
 0x66f   :  { %2746 = vtanh.f32 %v582_v31 }
 0x679   :  { %v2747_v33 = vpop.eup %2746 }
 0x67a   :  { %v584_v34 = vmul.f32 %v2747_v33, %v3036_v55 }
 0x67c   :  { %v585_v35 = vadd.f32 %v3041_v57, %v584_v34 }
 0x67e   :  { %588 = vrot.lane.b32.xlu1 %v585_v35, %s2876_s16  ;;  %v586_v38 = vmul.f32 %v585_v35, %v498_v24 }
 0x6f0   :  { %v589_v36 = vpop.permute.xlu1 %588 }
 0x6f1   :  { %v591_v37 = vmul.f32 %v589_v36, %v585_v35 }
 0x6f3   :  { %593 = vrot.lane.b32.xlu0 %v591_v37, %s2877_s19 }
 0x765   :  { %v594_v39 = vpop.permute.xlu0 %593 }
 0x766   :  { %v596_v40 = vadd.f32 %v594_v39, %v586_v38 }
 0x768   :  { %2748 = vtanh.f32 %v596_v40 }
 0x772   :  { %v2749_v41 = vpop.eup %2748 }
 0x773   :  { %599 = vrot.lane.b32.xlu1 %v2749_v41, %s2876_s16 }
 0x7e5   :  { %v600_v42 = vpop.permute.xlu1 %599 }
 0x7e6   :  { %v602_v43 = vmul.f32 %v600_v42, %v585_v35  ;;  %v898_v35 = vld [vmem:[#allocation2 + $0xc] sm:$0x3] }
 0x7e8   :  { %606 = vrot.lane.b32.xlu0 %v602_v43, %s2877_s19 }
 0x85a   :  { %v607_v44 = vpop.permute.xlu0 %606 }
 0x85b   :  { %2473 = vmatmul.mubr.msk.f32.vlgmr.msra.gmra.mrb[4].mxu0 %vm308_vm2, %v607_v44 }
 0x85c   :  { %2654 = vmatpush3.bf16.msra.mxu0 %v2976_v7  ;;  %2494 = vmatprep.mubr.msk.f32.mxu0 %vm2873_vm1, %v2874_v10 }
 0x85d   :  { %2655 = vmatprep.subr.bf16.mxu0 %v2872_v4 }
 0x860   :  { %2657 = vmatpush3.bf16.msra.mxu0 %v2990_v12 }
 0x861   :  { %2664 = vmatprep.subr.bf16.mxu0 %v2872_v4 }
 0x92e   :  { %v676_v46 = vpop.f32.mrb[4].mxu0 }
 0x92f   :  { %v680_v47 = vadd.f32 %v676_v46, %v604_v45  ;;  %v2474_v48 = vpop.f32.mrb[5].mxu0 }
 0x931   :  { %2750 = vtanh.f32 %v680_v47 }
 0x93b   :  { %v2751_v49 = vpop.eup %2750 }
 0x93c   :  { %v682_v50 = vmul.f32 %v2751_v49, %v3036_v55 }
 0x93e   :  { %v683_v51 = vadd.f32 %v3041_v57, %v682_v50 }
 0x940   :  { %686 = vrot.lane.b32.xlu1 %v683_v51, %s2876_s16  ;;  %v684_v54 = vmul.f32 %v683_v51, %v596_v40 }
 0x9b2   :  { %v687_v52 = vpop.permute.xlu1 %686 }
 0x9b3   :  { %v689_v53 = vmul.f32 %v687_v52, %v683_v51 }
 0x9b5   :  { %691 = vrot.lane.b32.xlu0 %v689_v53, %s2877_s19 }
 0xa27   :  { %v692_v56 = vpop.permute.xlu0 %691 }
 0xa28   :  { %v694_v58 = vadd.f32 %v692_v56, %v684_v54 }
 0xa2a   :  { %2752 = vtanh.f32 %v694_v58 }
 0xa34   :  { %v2753_v59 = vpop.eup %2752 }
 0xa35   :  { %697 = vrot.lane.b32.xlu1 %v2753_v59, %s2876_s16 }
 0xaa7   :  { %v698_v60 = vpop.permute.xlu1 %697 }
 0xaa8   :  { %v700_v61 = vmul.f32 %v698_v60, %v683_v51  ;;  %v996_v51 = vld [vmem:[#allocation2 + $0xe] sm:$0x3] }
 0xaaa   :  { %704 = vrot.lane.b32.xlu0 %v700_v61, %s2877_s19 }
 0xb1c   :  { %v705_v62 = vpop.permute.xlu0 %704 }
 0xb1d   :  { %2484 = vmatmul.mubr.msk.f32.vlgmr.msra.gmra.mrb[4].mxu1 %vm308_vm2, %v705_v62 }
 0xb1e   :  { %2660 = vmatpush3.bf16.msra.mxu1 %v2976_v7  ;;  %2505 = vmatprep.mubr.msk.f32.mxu1 %vm2873_vm1, %v2874_v10 }
 0xb1f   :  { %2661 = vmatprep.subr.bf16.mxu1 %v2872_v4 }
 0xb22   :  { %2663 = vmatpush3.bf16.msra.mxu1 %v2990_v12 }
 0xb23   :  { %2670 = vmatprep.subr.bf16.mxu1 %v2872_v4 }
 0xbf0   :  { %v774_v0 = vpop.f32.mrb[4].mxu1 }
 0xbf1   :  { %v778_v1 = vadd.f32 %v774_v0, %v702_v63  ;;  %v2485_v2 = vpop.f32.mrb[5].mxu1 }
 0xbf2   :  { %v53_v2 = vld [vmem:[%s3435_s6 + $0x8] sm:$0xff] }
 0xbf3   :  { %2754 = vtanh.f32 %v778_v1  ;;  %v52_v1 = vld [vmem:[%s3435_s6] sm:$0xff] }
 0xbfd   :  { %v2755_v3 = vpop.eup %2754 }
 0xbfe   :  { %v780_v5 = vmul.f32 %v2755_v3, %v3036_v55  ;;  %v54_v3 = vld [vmem:[%s3435_s6 + $0x10] sm:$0xff] }
 0xc00   :  { %v781_v6 = vadd.f32 %v3041_v57, %v780_v5  ;;  %v3146_v5 = vpack.c.bf16 %v53_v2, %v52_v1 }
 0xc02   :  { %784 = vrot.lane.b32.xlu1 %v781_v6, %s2876_s16  ;;  %v782_v11 = vmul.f32 %v781_v6, %v694_v58 }
 0xc74   :  { %v785_v8 = vpop.permute.xlu1 %784 }
 0xc75   :  { %v787_v9 = vmul.f32 %v785_v8, %v781_v6 }
 0xc77   :  { %789 = vrot.lane.b32.xlu0 %v787_v9, %s2877_s19 }
 0xce9   :  { %v790_v13 = vpop.permute.xlu0 %789 }
 0xcea   :  { %v792_v14 = vadd.f32 %v790_v13, %v782_v11 }
 0xcec   :  { %2756 = vtanh.f32 %v792_v14 }
 0xcf6   :  { %v2757_v15 = vpop.eup %2756 }
 0xcf7   :  { %795 = vrot.lane.b32.xlu1 %v2757_v15, %s2876_s16  ;;  %v3174_v15 = vld [vmem:[%s3436_s7] ss:$0 sm:$0xff]  ;;  %s2878_s7 = smov 96  }
 0xd69   :  { %v796_v16 = vpop.permute.xlu1 %795 }
 0xd6a   :  { %v798_v17 = vmul.f32 %v796_v16, %v781_v6  ;;  %v55_v6 = vld [vmem:[%s3435_s6 + $0x18] sm:$0xff] }
 0xd6b   :  { %v3152_v8 = vpack.c.bf16 %v55_v6, %v54_v3 }
 0xd6c   :  { %802 = vrot.lane.b32.xlu0 %v798_v17, %s2877_s19 }
 0xdde   :  { %v803_v19 = vpop.permute.xlu0 %802 }
 0xddf   :  { %2495 = vmatmul.mubr.msk.f32.vlgmr.msra.gmra.mrb[6].mxu0 %vm308_vm2, %v803_v19 }
 0xde0   :  { %2666 = vmatpush3.bf16.msra.mxu0 %v2976_v7  ;;  %2516 = vmatprep.mubr.msk.f32.mxu0 %vm2873_vm1, %v2874_v10 }
 0xde1   :  { %2667 = vmatprep.subr.bf16.mxu0 %v2872_v4 }
 0xde4   :  { %2669 = vmatpush3.bf16.msra.mxu0 %v2990_v12 }
 0xde5   :  { %2676 = vmatprep.subr.bf16.mxu0 %v2872_v4 }
 0xeb2   :  { %v872_v22 = vpop.f32.mrb[6].mxu0 }
 0xeb3   :  { %v876_v23 = vadd.f32 %v872_v22, %v800_v21  ;;  %v2496_v24 = vpop.f32.mrb[7].mxu0 }
 0xeb5   :  { %2758 = vtanh.f32 %v876_v23 }
 0xebf   :  { %v2759_v25 = vpop.eup %2758 }
 0xec0   :  { %v878_v26 = vmul.f32 %v2759_v25, %v3036_v55 }
 0xec2   :  { %v879_v27 = vadd.f32 %v3041_v57, %v878_v26 }
 0xec4   :  { %882 = vrot.lane.b32.xlu1 %v879_v27, %s2876_s16  ;;  %v880_v29 = vmul.f32 %v879_v27, %v792_v14 }
 0xf36   :  { %v883_v7 = vpop.permute.xlu1 %882 }
 0xf37   :  { %v885_v28 = vmul.f32 %v883_v7, %v879_v27 }
 0xf39   :  { %887 = vrot.lane.b32.xlu0 %v885_v28, %s2877_s19 }
 0xfab   :  { %v888_v12 = vpop.permute.xlu0 %887 }
 0xfac   :  { %v890_v30 = vadd.f32 %v888_v12, %v880_v29 }
 0xfae   :  { %2760 = vtanh.f32 %v890_v30 }
 0xfb8   :  { %v2761_v31 = vpop.eup %2760 }
 0xfb9   :  { %893 = vrot.lane.b32.xlu1 %v2761_v31, %s2876_s16 }
0x102b   :  { %v894_v32 = vpop.permute.xlu1 %893 }
0x102c   :  { %v896_v33 = vmul.f32 %v894_v32, %v879_v27 }
0x102e   :  { %900 = vrot.lane.b32.xlu0 %v896_v33, %s2877_s19 }
0x10a0   :  { %v901_v34 = vpop.permute.xlu0 %900 }
0x10a1   :  { %2506 = vmatmul.mubr.msk.f32.vlgmr.msra.gmra.mrb[6].mxu1 %vm308_vm2, %v901_v34 }
0x10a2   :  { %2527 = vmatprep.mubr.msk.f32.mxu1 %vm2873_vm1, %v2874_v10  ;;  %2672 = vmatpush3.bf16.msra.mxu1 %v3146_v5 }
0x10a3   :  { %2673 = vmatprep.subr.bf16.mxu1 %v2872_v4 }
0x10a6   :  { %2675 = vmatpush3.bf16.msra.mxu1 %v3152_v8 }
0x10a7   :  { %2682 = vmatprep.subr.bf16.mxu1 %v2872_v4 }
0x1174   :  { %v970_v36 = vpop.f32.mrb[6].mxu1 }
0x1175   :  { %v974_v37 = vadd.f32 %v970_v36, %v898_v35  ;;  %v2507_v38 = vpop.f32.mrb[7].mxu1 }
0x1177   :  { %2762 = vtanh.f32 %v974_v37 }
0x1181   :  { %v2763_v39 = vpop.eup %2762 }
0x1182   :  { %v976_v40 = vmul.f32 %v2763_v39, %v3036_v55 }
0x1184   :  { %v977_v41 = vadd.f32 %v3041_v57, %v976_v40 }
0x1186   :  { %980 = vrot.lane.b32.xlu1 %v977_v41, %s2876_s16  ;;  %v978_v44 = vmul.f32 %v977_v41, %v890_v30 }
0x11f8   :  { %v981_v42 = vpop.permute.xlu1 %980 }
0x11f9   :  { %v983_v43 = vmul.f32 %v981_v42, %v977_v41 }
0x11fb   :  { %985 = vrot.lane.b32.xlu0 %v983_v43, %s2877_s19 }
0x126d   :  { %v986_v45 = vpop.permute.xlu0 %985 }
0x126e   :  { %v988_v46 = vadd.f32 %v986_v45, %v978_v44 }
0x1270   :  { %2764 = vtanh.f32 %v988_v46 }
0x127a   :  { %v2765_v47 = vpop.eup %2764 }
0x127b   :  { %991 = vrot.lane.b32.xlu1 %v2765_v47, %s2876_s16 }
0x12ed   :  { %v992_v48 = vpop.permute.xlu1 %991 }
0x12ee   :  { %v994_v49 = vmul.f32 %v992_v48, %v977_v41 }
0x12f0   :  { %998 = vrot.lane.b32.xlu0 %v994_v49, %s2877_s19 }
0x1362   :  { %v999_v50 = vpop.permute.xlu0 %998 }
0x1363   :  { %2517 = vmatmul.mubr.msk.f32.vlgmr.msra.gmra.mrb[8].mxu0 %vm308_vm2, %v999_v50 }
0x1364   :  { %2538 = vmatprep.mubr.msk.f32.mxu0 %vm2873_vm1, %v2874_v10  ;;  %2678 = vmatpush3.bf16.msra.mxu0 %v3146_v5 }
0x1365   :  { %2679 = vmatprep.subr.bf16.mxu0 %v2872_v4 }
0x1368   :  { %2681 = vmatpush3.bf16.msra.mxu0 %v3152_v8 }
0x1369   :  { %2688 = vmatprep.subr.bf16.mxu0 %v2872_v4 }
0x1436   :  { %v1068_v52 = vpop.f32.mrb[8].mxu0 }
0x1437   :  { %v1072_v53 = vadd.f32 %v1068_v52, %v996_v51  ;;  %v2518_v54 = vpop.f32.mrb[9].mxu0 }
0x1439   :  { %2766 = vtanh.f32 %v1072_v53 }
0x1443   :  { %v2767_v56 = vpop.eup %2766 }
0x1444   :  { %v1074_v58 = vmul.f32 %v2767_v56, %v3036_v55 }
0x1446   :  { %v1075_v59 = vadd.f32 %v3041_v57, %v1074_v58 }
0x1448   :  { %1078 = vrot.lane.b32.xlu1 %v1075_v59, %s2876_s16  ;;  %v1076_v62 = vmul.f32 %v1075_v59, %v988_v46 }
0x14ba   :  { %v1079_v60 = vpop.permute.xlu1 %1078 }
0x14bb   :  { %v1081_v61 = vmul.f32 %v1079_v60, %v1075_v59 }
0x14bd   :  { %1083 = vrot.lane.b32.xlu0 %v1081_v61, %s2877_s19 }
0x152f   :  { %v1084_v63 = vpop.permute.xlu0 %1083 }
0x1530   :  { %v3134_v0 = vadd.f32 %v1084_v63, %v1076_v62 }
0x1532   :  { %2768 = vtanh.f32 %v3134_v0 }
0x153c   :  { %v2769_v9 = vpop.eup %2768 }
0x153d   :  { %1089 = vrot.lane.b32.xlu1 %v2769_v9, %s2876_s16 }
0x15af   :  { %v1090_v11 = vpop.permute.xlu1 %1089 }
0x15b0   :  { %v1092_v13 = vmul.f32 %v1090_v11, %v1075_v59 }
0x15b2   :  { %1094 = vrot.lane.b32.xlu0 %v1092_v13, %s2877_s19 }
0x1624   :  { %v1095_v14 = vpop.permute.xlu0 %1094 }
0x1625   :  { %2528 = vmatmul.mubr.msk.f32.vlgmr.msra.gmra.mrb[8].mxu1 %vm308_vm2, %v1095_v14  ;;  %1098 = vst.msk [vmem:[#allocation6] sm:$0x3] %vm1097_vm3, %v1095_v14 }
0x1626   :  { %2684 = vmatpush3.bf16.msra.mxu1 %v3146_v5  ;;  %2549 = vmatprep.mubr.msk.f32.mxu1 %vm2873_vm1, %v2874_v10 }
0x1627   :  { %2685 = vmatprep.subr.bf16.mxu1 %v2872_v4 }
0x162a   :  { %2687 = vmatpush3.bf16.msra.mxu1 %v3152_v8 }
0x162b   :  { %2694 = vmatprep.subr.bf16.mxu1 %v2872_v4 }
0x16f8   :  { %v1172_v16 = vpop.f32.mrb[8].mxu1 }
0x16f9   :  { %v1173_v17 = vadd.f32 %v3174_v15, %v1172_v16  ;;  %v2529_v19 = vpop.f32.mrb[9].mxu1 }
0x16fb   :  { %2770 = vtanh.f32 %v1173_v17 }
0x1705   :  { %v2771_v21 = vpop.eup %2770 }
0x1706   :  { %v1177_v22 = vmul.f32 %v2771_v21, %v3036_v55 }
0x1708   :  { %v1178_v23 = vadd.f32 %v3041_v57, %v1177_v22 }
0x170a   :  { %1181 = vrot.lane.b32.xlu1 %v1178_v23, %s2876_s16  ;;  %v1179_v26 = vmul.f32 %v1178_v23, %v3134_v0 }
0x177c   :  { %v1182_v24 = vpop.permute.xlu1 %1181 }
0x177d   :  { %v1184_v25 = vmul.f32 %v1182_v24, %v1178_v23 }
0x177f   :  { %1186 = vrot.lane.b32.xlu0 %v1184_v25, %s2877_s19 }
0x17f1   :  { %v1187_v27 = vpop.permute.xlu0 %1186 }
0x17f2   :  { %v1189_v7 = vadd.f32 %v1187_v27, %v1179_v26 }
0x17f4   :  { %2772 = vtanh.f32 %v1189_v7 }
0x17fe   :  { %v2773_v28 = vpop.eup %2772 }
0x17ff   :  { %1192 = vrot.lane.b32.xlu1 %v2773_v28, %s2876_s16 }
0x1871   :  { %v1193_v29 = vpop.permute.xlu1 %1192 }
0x1872   :  { %v3183_v12 = vmul.f32 %v1193_v29, %v1178_v23 }
0x1874   :  { %1197 = vrot.lane.b32.xlu0 %v3183_v12, %s2877_s19 }
0x18e6   :  { %v1198_v30 = vpop.permute.xlu0 %1197 }
0x18e7   :  { %2539 = vmatmul.mubr.msk.f32.vlgmr.msra.gmra.mrb[10].mxu0 %vm308_vm2, %v1198_v30 }
0x18e8   :  { %2690 = vmatpush3.bf16.msra.mxu0 %v3146_v5  ;;  %2560 = vmatprep.mubr.msk.f32.mxu0 %vm2873_vm1, %v2874_v10 }
0x18e9   :  { %2691 = vmatprep.subr.bf16.mxu0 %v2872_v4 }
0x18ec   :  { %2693 = vmatpush3.bf16.msra.mxu0 %v3152_v8 }
0x18ed   :  { %2700 = vmatprep.subr.bf16.mxu0 %v2872_v4 }
0x19ba   :  { %v1267_v31 = vpop.f32.mrb[10].mxu0 }
0x19bb   :  { %v1268_v32 = vadd.f32 %v3174_v15, %v1267_v31  ;;  %v2540_v33 = vpop.f32.mrb[11].mxu0 }
0x19bd   :  { %2774 = vtanh.f32 %v1268_v32 }
0x19c7   :  { %v2775_v34 = vpop.eup %2774 }
0x19c8   :  { %v1272_v35 = vmul.f32 %v2775_v34, %v3036_v55 }
0x19ca   :  { %v1273_v36 = vadd.f32 %v3041_v57, %v1272_v35 }
0x19cc   :  { %1276 = vrot.lane.b32.xlu1 %v1273_v36, %s2876_s16  ;;  %v1274_v39 = vmul.f32 %v1273_v36, %v1189_v7 }
0x1a3e   :  { %v1277_v37 = vpop.permute.xlu1 %1276 }
0x1a3f   :  { %v1279_v38 = vmul.f32 %v1277_v37, %v1273_v36 }
0x1a41   :  { %1281 = vrot.lane.b32.xlu0 %v1279_v38, %s2877_s19 }
0x1ab3   :  { %v1282_v40 = vpop.permute.xlu0 %1281 }
0x1ab4   :  { %v1284_v41 = vadd.f32 %v1282_v40, %v1274_v39 }
0x1ab6   :  { %2776 = vtanh.f32 %v1284_v41 }
0x1ac0   :  { %v2777_v42 = vpop.eup %2776 }
0x1ac1   :  { %1287 = vrot.lane.b32.xlu1 %v2777_v42, %s2876_s16 }
0x1b33   :  { %v1288_v43 = vpop.permute.xlu1 %1287 }
0x1b34   :  { %v3200_v44 = vmul.f32 %v1288_v43, %v1273_v36 }
0x1b36   :  { %1292 = vrot.lane.b32.xlu0 %v3200_v44, %s2877_s19 }
0x1ba8   :  { %v1293_v45 = vpop.permute.xlu0 %1292 }
0x1ba9   :  { %2550 = vmatmul.mubr.msk.f32.vlgmr.msra.gmra.mrb[10].mxu1 %vm308_vm2, %v1293_v45 }
0x1baa   :  { %2696 = vmatpush3.bf16.msra.mxu1 %v3146_v5  ;;  %2571 = vmatprep.mubr.msk.f32.mxu1 %vm2873_vm1, %v2874_v10 }
0x1bab   :  { %2697 = vmatprep.subr.bf16.mxu1 %v2872_v4 }
0x1bae   :  { %2699 = vmatpush3.bf16.msra.mxu1 %v3152_v8 }
0x1baf   :  { %2706 = vmatprep.subr.bf16.mxu1 %v2872_v4 }
0x1c7c   :  { %v1362_v46 = vpop.f32.mrb[10].mxu1 }
0x1c7d   :  { %v1363_v47 = vadd.f32 %v3174_v15, %v1362_v46  ;;  %v2551_v48 = vpop.f32.mrb[11].mxu1 }
0x1c7f   :  { %2778 = vtanh.f32 %v1363_v47 }
0x1c89   :  { %v2779_v49 = vpop.eup %2778 }
0x1c8a   :  { %v1367_v50 = vmul.f32 %v2779_v49, %v3036_v55 }
0x1c8c   :  { %v1368_v51 = vadd.f32 %v3041_v57, %v1367_v50 }
0x1c8e   :  { %1371 = vrot.lane.b32.xlu1 %v1368_v51, %s2876_s16  ;;  %v1369_v54 = vmul.f32 %v1368_v51, %v1284_v41 }
0x1d00   :  { %v1372_v52 = vpop.permute.xlu1 %1371 }
0x1d01   :  { %v1374_v53 = vmul.f32 %v1372_v52, %v1368_v51 }
0x1d03   :  { %1376 = vrot.lane.b32.xlu0 %v1374_v53, %s2877_s19 }
0x1d75   :  { %v1377_v56 = vpop.permute.xlu0 %1376 }
0x1d76   :  { %v1379_v58 = vadd.f32 %v1377_v56, %v1369_v54 }
0x1d78   :  { %2780 = vtanh.f32 %v1379_v58 }
0x1d82   :  { %v2781_v59 = vpop.eup %2780 }
0x1d83   :  { %1382 = vrot.lane.b32.xlu1 %v2781_v59, %s2876_s16 }
0x1df5   :  { %v1383_v60 = vpop.permute.xlu1 %1382 }
0x1df6   :  { %v3217_v61 = vmul.f32 %v1383_v60, %v1368_v51 }
0x1df8   :  { %1387 = vrot.lane.b32.xlu0 %v3217_v61, %s2877_s19 }
0x1e6a   :  { %v1388_v62 = vpop.permute.xlu0 %1387 }
0x1e6b   :  { %2561 = vmatmul.mubr.msk.f32.vlgmr.msra.gmra.mrb[12].mxu0 %vm308_vm2, %v1388_v62 }
0x1e6c   :  { %2702 = vmatpush3.bf16.msra.mxu0 %v3146_v5  ;;  %2582 = vmatprep.mubr.msk.f32.mxu0 %vm2873_vm1, %v2874_v10 }
0x1e6d   :  { %2703 = vmatprep.subr.bf16.mxu0 %v2872_v4 }
0x1e70   :  { %2705 = vmatpush3.bf16.msra.mxu0 %v3152_v8 }
0x1e71   :  { %2712 = vmatprep.subr.bf16.mxu0 %v2872_v4 }
0x1f3e   :  { %v1457_v63 = vpop.f32.mrb[12].mxu0 }
0x1f3f   :  { %v1458_v1 = vadd.f32 %v3174_v15, %v1457_v63  ;;  %v2562_v2 = vpop.f32.mrb[13].mxu0 }
0x1f41   :  { %2782 = vtanh.f32 %v1458_v1 }
0x1f4b   :  { %v2783_v3 = vpop.eup %2782 }
0x1f4c   :  { %v1462_v6 = vmul.f32 %v2783_v3, %v3036_v55 }
0x1f4e   :  { %v1463_v9 = vadd.f32 %v3041_v57, %v1462_v6 }
0x1f50   :  { %1466 = vrot.lane.b32.xlu1 %v1463_v9, %s2876_s16  ;;  %v1464_v14 = vmul.f32 %v1463_v9, %v1379_v58 }
0x1fc2   :  { %v1467_v11 = vpop.permute.xlu1 %1466 }
0x1fc3   :  { %v1469_v13 = vmul.f32 %v1467_v11, %v1463_v9 }
0x1fc5   :  { %1471 = vrot.lane.b32.xlu0 %v1469_v13, %s2877_s19 }
0x2037   :  { %v1472_v16 = vpop.permute.xlu0 %1471 }
0x2038   :  { %v1474_v17 = vadd.f32 %v1472_v16, %v1464_v14 }
0x203a   :  { %2784 = vtanh.f32 %v1474_v17 }
0x2044   :  { %v2785_v19 = vpop.eup %2784 }
0x2045   :  { %1477 = vrot.lane.b32.xlu1 %v2785_v19, %s2876_s16  ;;  %v1867_v19 = vrot.slane %v3183_v12, %v3019_v20 }
0x20b7   :  { %v1478_v21 = vpop.permute.xlu1 %1477 }
0x20b8   :  { %v3234_v22 = vmul.f32 %v1478_v21, %v1463_v9 }
0x20ba   :  { %1482 = vrot.lane.b32.xlu0 %v3234_v22, %s2877_s19 }
0x212c   :  { %v1483_v23 = vpop.permute.xlu0 %1482 }
0x212d   :  { %2572 = vmatmul.mubr.msk.f32.vlgmr.msra.gmra.mrb[12].mxu1 %vm308_vm2, %v1483_v23  ;;  %v1875_v23 = vrot.slane %v1867_v19, %v3019_v20 }
0x212e   :  { %2708 = vmatpush3.bf16.msra.mxu1 %v3146_v5  ;;  %2593 = vmatprep.mubr.msk.f32.mxu1 %vm2873_vm1, %v2874_v10 }
0x212f   :  { %2709 = vmatprep.subr.bf16.mxu1 %v2872_v4 }
0x2132   :  { %2711 = vmatpush3.bf16.msra.mxu1 %v3152_v8 }
0x2200   :  { %v1552_v24 = vpop.f32.mrb[12].mxu1 }
0x2201   :  { %v1553_v25 = vadd.f32 %v3174_v15, %v1552_v24  ;;  %v2573_v26 = vpop.f32.mrb[13].mxu1 }
0x2203   :  { %2786 = vtanh.f32 %v1553_v25  ;;  %v3293_v25 = vsub.s32 0, %v3013_v18  ;;  %v1868_v18 = vcombine.high %v1867_v19, %v1867_v19  ;;  %v59_v19 = vld [vmem:[%s3437_s8 + $0x10] sm:$0xff] }
0x2205   :  { %v1886_v12 = vrot.slane %v1875_v23, %v3293_v25 }
0x220d   :  { %v2787_v27 = vpop.eup %2786 }
0x220e   :  { %v1557_v7 = vmul.f32 %v2787_v27, %v3036_v55 }
0x2210   :  { %v1558_v28 = vadd.f32 %v3041_v57, %v1557_v7 }
0x2212   :  { %1561 = vrot.lane.b32.xlu1 %v1558_v28, %s2876_s16  ;;  %v1559_v31 = vmul.f32 %v1558_v28, %v1474_v17 }
0x2284   :  { %v1562_v29 = vpop.permute.xlu1 %1561 }
0x2285   :  { %v1564_v30 = vmul.f32 %v1562_v29, %v1558_v28 }
0x2287   :  { %1566 = vrot.lane.b32.xlu0 %v1564_v30, %s2877_s19 }
0x22f9   :  { %v1567_v32 = vpop.permute.xlu0 %1566 }
0x22fa   :  { %v1569_v33 = vadd.f32 %v1567_v32, %v1559_v31  ;;  %v1882_v31 = vrot.slane %v1868_v18, %v3019_v20 }
0x22fc   :  { %2788 = vtanh.f32 %v1569_v33 }
0x2306   :  { %v2789_v34 = vpop.eup %2788 }
0x2307   :  { %1572 = vrot.lane.b32.xlu1 %v2789_v34, %s2876_s16 }
0x2379   :  { %v1573_v35 = vpop.permute.xlu1 %1572 }
0x237a   :  { %v3250_v36 = vmul.f32 %v1573_v35, %v1558_v28 }
0x237c   :  { %1577 = vrot.lane.b32.xlu0 %v3250_v36, %s2877_s19 }
0x23ee   :  { %v1578_v37 = vpop.permute.xlu0 %1577 }
0x23ef   :  { %2583 = vmatmul.mubr.msk.f32.vlgmr.msra.gmra.mrb[14].mxu0 %vm308_vm2, %v1578_v37 }
0x23f0   :  { %2714 = vmatpush3.bf16.msra.mxu0 %v3146_v5  ;;  %2604 = vmatprep.mubr.msk.f32.mxu0 %vm2873_vm1, %v2874_v10 }
0x23f1   :  { %2715 = vmatprep.subr.bf16.mxu0 %v2872_v4 }
0x23f4   :  { %2717 = vmatpush3.bf16.msra.mxu0 %v3152_v8 }
0x24c2   :  { %v1647_v38 = vpop.f32.mrb[14].mxu0 }
0x24c3   :  { %v1648_v39 = vadd.f32 %v3174_v15, %v1647_v38  ;;  %v2584_v40 = vpop.f32.mrb[15].mxu0 }
0x24c5   :  { %2790 = vtanh.f32 %v1648_v39 }
0x24cf   :  { %v2791_v41 = vpop.eup %2790 }
0x24d0   :  { %v1652_v42 = vmul.f32 %v2791_v41, %v3036_v55 }
0x24d2   :  { %v1653_v43 = vadd.f32 %v3041_v57, %v1652_v42 }
0x24d4   :  { %1656 = vrot.lane.b32.xlu1 %v1653_v43, %s2876_s16  ;;  %v1654_v10 = vmul.f32 %v1653_v43, %v1569_v33  ;;  %v1890_v33 = vrot.slane %v1882_v31, %v3293_v25 }
0x2546   :  { %v1657_v5 = vpop.permute.xlu1 %1656 }
0x2547   :  { %v1659_v45 = vmul.f32 %v1657_v5, %v1653_v43 }
0x2549   :  { %1661 = vrot.lane.b32.xlu0 %v1659_v45, %s2877_s19  ;;  %v1906_v45 = vrot.slane %v3200_v44, %v3019_v20 }
0x25bb   :  { %v1662_v4 = vpop.permute.xlu0 %1661 }
0x25bc   :  { %v1664_v46 = vadd.f32 %v1662_v4, %v1654_v10  ;;  %v1914_v4 = vrot.slane %v1906_v45, %v3019_v20 }
0x25be   :  { %2792 = vtanh.f32 %v1664_v46 }
0x25c8   :  { %v2793_v8 = vpop.eup %2792 }
0x25c9   :  { %1667 = vrot.lane.b32.xlu1 %v2793_v8, %s2876_s16 }
0x263b   :  { %v1668_v47 = vpop.permute.xlu1 %1667 }
0x263c   :  { %v3266_v48 = vmul.f32 %v1668_v47, %v1653_v43 }
0x263e   :  { %1672 = vrot.lane.b32.xlu0 %v3266_v48, %s2877_s19 }
0x26b0   :  { %v1673_v49 = vpop.permute.xlu0 %1672 }
0x26b1   :  { %2594 = vmatmul.mubr.msk.f32.vlgmr.msra.gmra.mrb[14].mxu1 %vm308_vm2, %v1673_v49  ;;  %v2058_v49 = vrot.slane %v3266_v48, %v3019_v20 }
0x2784   :  { %v1742_v50 = vpop.f32.mrb[14].mxu1 }
0x2785   :  { %v1743_v51 = vadd.f32 %v3174_v15, %v1742_v50  ;;  %v2595_v52 = vpop.f32.mrb[15].mxu1  ;;  %v1925_v50 = vrot.slane %v1914_v4, %v3293_v25 }
0x2787   :  { %2794 = vtanh.f32 %v1743_v51  ;;  %v1907_v51 = vcombine.high %v1906_v45, %v1906_v45 }
0x2791   :  { %v2795_v53 = vpop.eup %2794 }
0x2792   :  { %v1747_v54 = vmul.f32 %v2795_v53, %v3036_v55 }
0x2794   :  { %v1748_v56 = vadd.f32 %v3041_v57, %v1747_v54 }
0x2796   :  { %1751 = vrot.lane.b32.xlu1 %v1748_v56, %s2876_s16  ;;  %v1749_v60 = vmul.f32 %v1748_v56, %v1664_v46 }
0x2808   :  { %v1752_v58 = vpop.permute.xlu1 %1751 }
0x2809   :  { %v1754_v59 = vmul.f32 %v1752_v58, %v1748_v56  ;;  %v1921_v58 = vrot.slane %v1907_v51, %v3019_v20 }
0x280b   :  { %1756 = vrot.lane.b32.xlu0 %v1754_v59, %s2877_s19  ;;  %v2059_v59 = vcombine.high %v2058_v49, %v2058_v49 }
0x287d   :  { %v1757_v62 = vpop.permute.xlu0 %1756 }
0x287e   :  { %v1759_v63 = vadd.f32 %v1757_v62, %v1749_v60  ;;  %v1929_v62 = vrot.slane %v1921_v58, %v3293_v25 }
0x2880   :  { %2796 = vtanh.f32 %v1759_v63 }
0x288a   :  { %v2797_v1 = vpop.eup %2796 }
0x288b   :  { %1762 = vrot.lane.b32.xlu1 %v2797_v1, %s2876_s16 }
0x28fd   :  { %v1763_v2 = vpop.permute.xlu1 %1762 }
0x28fe   :  { %v1765_v3 = vmul.f32 %v1763_v2, %v1748_v56 }
0x2900   :  { %1767 = vrot.lane.b32.xlu0 %v1765_v3, %s2877_s19 }
0x2972   :  { %v1768_v6 = vpop.permute.xlu0 %1767 }
0x2973   :  { %2605 = vmatmul.mubr.msk.f32.vlgmr.msra.gmra.mrb[16].mxu0 %vm308_vm2, %v1768_v6 }
0x2a46   :  { %v1837_v9 = vpop.f32.mrb[16].mxu0 }
0x2a47   :  { %v1838_v11 = vadd.f32 %v3174_v15, %v1837_v9  ;;  %v2606_v13 = vpop.f32.mrb[17].mxu0  ;;  %v1944_v15 = vrot.slane %v3217_v61, %v3019_v20  ;;  %v2096_v61 = vrot.slane %v1765_v3, %v3019_v20  ;;  %v2073_v3 = vrot.slane %v2059_v59, %v3019_v20 }
0x2a48   :  { %v58_v13 = vld [vmem:[%s3437_s8 + $0x8] sm:$0xff] }
0x2a49   :  { %2798 = vtanh.f32 %v1838_v11  ;;  %v2104_v7 = vrot.slane %v2096_v61, %v3019_v20  ;;  %v1945_v29 = vcombine.high %v1944_v15, %v1944_v15  ;;  %v2097_v35 = vcombine.high %v2096_v61, %v2096_v61  ;;  %v57_v11 = vld [vmem:[%s3437_s8] sm:$0xff] }
0x2a4a   :  { %v2081_v9 = vrot.slane %v2073_v3, %v3293_v25 }
0x2a4b   :  { %v2115_v30 = vrot.slane %v2104_v7, %v3293_v25  ;;  %v1959_v34 = vrot.slane %v1945_v29, %v3019_v20  ;;  %v2111_v39 = vrot.slane %v2097_v35, %v3019_v20 }
0x2a4d   :  { %v2119_v40 = vrot.slane %v2111_v39, %v3293_v25 }
0x2a53   :  { %v2799_v14 = vpop.eup %2798 }
0x2a54   :  { %v1842_v16 = vmul.f32 %v2799_v14, %v3036_v55  ;;  %v1952_v55 = vrot.slane %v1944_v15, %v3019_v20  ;;  %v2718_v14 = vpack.c.bf16 %v58_v13, %v57_v11 }
0x2a56   :  { %v3282_v17 = vadd.f32 %v3041_v57, %v1842_v16  ;;  %v2020_v57 = vrot.slane %v3250_v36, %v3019_v20  ;;  %v1963_v27 = vrot.slane %v1952_v55, %v3293_v25  ;;  %v1967_v36 = vrot.slane %v1959_v34, %v3293_v25  ;;  %2719 = vmatprep.subr.bf16.mxu1 %v2718_v14 }
0x2a57   :  { %2721 = vmatpush3.bf16.msra.mxu1 %v2718_v14 }
0x2a58   :  { %1846 = vrot.lane.b32.xlu1 %v3282_v17, %s2876_s16  ;;  %v2028_v26 = vrot.slane %v2020_v57, %v3019_v20  ;;  %v2021_v32 = vcombine.high %v2020_v57, %v2020_v57  ;;  %v1844_v41 = vmul.f32 %v3282_v17, %v1759_v63 }
0x2a5a   :  { %v2039_v28 = vrot.slane %v2028_v26, %v3293_v25  ;;  %v2035_v37 = vrot.slane %v2021_v32, %v3019_v20 }
0x2a5c   :  { %v2043_v38 = vrot.slane %v2035_v37, %v3293_v25 }
0x2aca   :  { %v1847_v21 = vpop.permute.xlu1 %1846 }
0x2acb   :  { %v1849_v24 = vmul.f32 %v1847_v21, %v3282_v17  ;;  %v60_v21 = vld [vmem:[%s3437_s8 + $0x18] sm:$0xff]  ;;  %s2879_s8 = smov [#allocation6]  }
0x2acc   :  { %v2722_v15 = vpack.c.bf16 %v60_v21, %v59_v19  ;;  %s2276_s29 = sshll.u32 %s2879_s8, 4  ;;  %s2277_s29 = int_to_ptr.vmem [resolvable:$true] %s2276_s29 }
0x2acd   :  { %1851 = vrot.lane.b32.xlu0 %v1849_v24, %s2877_s19  ;;  %s2802_s30 = scalar_lea.vmem %s2277_s29, 32  ;;  %p2807_p1 = scmp.lt.s32.totalorder %s2277_s29, %s2277_s29 }
0x2ace   :  { %2723 = vmatprep.subr.bf16.mxu1 %v2722_v15  ;;  %p2803_p0 = scmp.ne.s32.totalorder %s2277_s29, %s2802_s30  ;;  %p2808_p2 = scmp.lt.s32.totalorder %s2802_s30, %s2802_s30 }
0x2acf   :  { %2725 = vmatpush3.bf16.msra.mxu1 %v2722_v15 }
0x2ad0   :  { %p2809_p3 = por %p2808_p2, %p2807_p1 }
0x2ad1   :  { %1891 = vrot.lane.b32.xlu0 %v1886_v12, %s2877_s19 }
0x2ad2   :  { %p2810_p4 = pnand %p2809_p3, %p2803_p0 }
0x2ad5   :  { %1968 = vrot.lane.b32.xlu0 %v1963_v27, %s2877_s19 }
0x2ad9   :  { %2044 = vrot.lane.b32.xlu0 %v2039_v28, %s2877_s19 }
0x2add   :  { %2120 = vrot.lane.b32.xlu0 %v2115_v30, %s2877_s19 }
0x2ae1   :  { %1893 = vrot.lane.b32.xlu0 %v1890_v33, %s2877_s19 }
0x2ae5   :  { %1970 = vrot.lane.b32.xlu0 %v1967_v36, %s2877_s19 }
0x2ae9   :  { %2046 = vrot.lane.b32.xlu0 %v2043_v38, %s2877_s19 }
0x2aed   :  { %2122 = vrot.lane.b32.xlu0 %v2119_v40, %s2877_s19 }
0x2af1   :  { %1100 = vrot.lane.b32.xlu0 %v3134_v0, %s2878_s7  ;;  %v1982_v0 = vrot.slane %v3234_v22, %v3019_v20  ;;  %v2066_v22 = vrot.slane %v2058_v49, %v3019_v20 }
0x2af3   :  { %v1990_v47 = vrot.slane %v1982_v0, %v3019_v20  ;;  %v1983_v54 = vcombine.high %v1982_v0, %v1982_v0  ;;  %v2077_v48 = vrot.slane %v2066_v22, %v3293_v25 }
0x2af5   :  { %v2001_v53 = vrot.slane %v1990_v47, %v3293_v25  ;;  %v1997_v63 = vrot.slane %v1983_v54, %v3019_v20 }
0x2af7   :  { %v2005_v2 = vrot.slane %v1997_v63, %v3293_v25 }
0x2b3f   :  { %v1852_v42 = vpop.permute.xlu0 %1851 }
0x2b40   :  { %v1854_v43 = vadd.f32 %v1852_v42, %v1844_v41 }
0x2b42   :  { %2800 = vtanh.f32 %v1854_v43 }
0x2b43   :  { %v1892_v5 = vpop.permute.xlu0 %1891 }
0x2b44   :  { %1898 = vst.msk [vmem:[#allocation3] sm:$0x1] %vm1897_vm4, %v1892_v5 }
0x2b47   :  { %v1969_v10 = vpop.permute.xlu0 %1968 }
0x2b48   :  { %1974 = vst.msk [vmem:[#allocation3 + $0x2] sm:$0x1] %vm1897_vm4, %v1969_v10 }
0x2b4b   :  { %v2045_v46 = vpop.permute.xlu0 %2044 }
0x2b4c   :  { %v2801_v8 = vpop.eup %2800  ;;  %2050 = vst.msk [vmem:[#allocation3 + $0x4] sm:$0x1] %vm1897_vm4, %v2045_v46 }
0x2b4d   :  { %1857 = vrot.lane.b32.xlu1 %v2801_v8, %s2876_s16 }
0x2b4f   :  { %v2121_v44 = vpop.permute.xlu0 %2120 }
0x2b50   :  { %2126 = vst.msk [vmem:[#allocation3 + $0x6] sm:$0x1] %vm1897_vm4, %v2121_v44 }
0x2b51   :  { %1930 = vrot.lane.b32.xlu1 %v1925_v50, %s2877_s19 }
0x2b53   :  { %v1894_v52 = vpop.permute.xlu0 %1893 }
0x2b54   :  { %1899 = vst.msk [vmem:[#allocation3 + $0x8] sm:$0x1] %vm1897_vm4, %v1894_v52 }
0x2b55   :  { %2006 = vrot.lane.b32.xlu1 %v2001_v53, %s2877_s19 }
0x2b57   :  { %v1971_v56 = vpop.permute.xlu0 %1970 }
0x2b58   :  { %1975 = vst.msk [vmem:[#allocation3 + $0xa] sm:$0x1] %vm1897_vm4, %v1971_v56 }
0x2b59   :  { %2082 = vrot.lane.b32.xlu1 %v2077_v48, %s2877_s19 }
0x2b5b   :  { %v2047_v60 = vpop.permute.xlu0 %2046 }
0x2b5c   :  { %2051 = vst.msk [vmem:[#allocation3 + $0xc] sm:$0x1] %vm1897_vm4, %v2047_v60 }
0x2b5d   :  { %1932 = vrot.lane.b32.xlu1 %v1929_v62, %s2877_s19 }
0x2b5f   :  { %v2123_v1 = vpop.permute.xlu0 %2122 }
0x2b60   :  { %2127 = vst.msk [vmem:[#allocation3 + $0xe] sm:$0x1] %vm1897_vm4, %v2123_v1 }
0x2b61   :  { %2008 = vrot.lane.b32.xlu1 %v2005_v2, %s2877_s19 }
0x2b63   :  { %v1101_v6 = vpop.permute.xlu0 %1100 }
0x2b64   :  { %1103 = vst.msk [vmem:[#allocation8] sm:$0x3] %vm1097_vm3, %v1101_v6 }
0x2b65   :  { %2084 = vrot.lane.b32.xlu1 %v2081_v9, %s2877_s19 }
0x2bbf   :  { %v1858_v16 = vpop.permute.xlu1 %1857 }
0x2bc0   :  { %v1860_v23 = vmul.f32 %v1858_v16, %v3282_v17 }
0x2bc2   :  { %v2135_v24 = vrot.slane %v1860_v23, %v3019_v20 }
0x2bc3   :  { %v1931_v55 = vpop.permute.xlu1 %1930 }
0x2bc4   :  { %v2136_v57 = vcombine.high %v2135_v24, %v2135_v24  ;;  %v2143_v12 = vrot.slane %v2135_v24, %v3019_v20  ;;  %1936 = vst.msk [vmem:[#allocation3 + $0x1] sm:$0x1] %vm1897_vm4, %v1931_v55 }
0x2bc6   :  { %v2154_v26 = vrot.slane %v2143_v12, %v3293_v25  ;;  %v2150_v61 = vrot.slane %v2136_v57, %v3019_v20 }
0x2bc7   :  { %v2007_v27 = vpop.permute.xlu1 %2006 }
0x2bc8   :  { %2012 = vst.msk [vmem:[#allocation3 + $0x3] sm:$0x1] %vm1897_vm4, %v2007_v27  ;;  %2159 = vrot.lane.b32.xlu1 %v2154_v26, %s2877_s19  ;;  %v2158_v17 = vrot.slane %v2150_v61, %v3293_v25 }
0x2bcb   :  { %v2083_v18 = vpop.permute.xlu1 %2082 }
0x2bcc   :  { %2088 = vst.msk [vmem:[#allocation3 + $0x5] sm:$0x1] %vm1897_vm4, %v2083_v18  ;;  %2161 = vrot.lane.b32.xlu1 %v2158_v17, %s2877_s19 }
0x2bcf   :  { %v1933_v7 = vpop.permute.xlu1 %1932 }
0x2bd0   :  { %1937 = vst.msk [vmem:[#allocation3 + $0x9] sm:$0x1] %vm1897_vm4, %v1933_v7 }
0x2bd3   :  { %v2009_v28 = vpop.permute.xlu1 %2008 }
0x2bd4   :  { %2013 = vst.msk [vmem:[#allocation3 + $0xb] sm:$0x1] %vm1897_vm4, %v2009_v28 }
0x2bd7   :  { %v2085_v29 = vpop.permute.xlu1 %2084 }
0x2bd8   :  { %2089 = vst.msk [vmem:[#allocation3 + $0xd] sm:$0x1] %vm1897_vm4, %v2085_v29 }
0x2c3a   :  { %v2160_v20 = vpop.permute.xlu1 %2159 }
0x2c3b   :  { %2165 = vst.msk [vmem:[#allocation3 + $0x7] sm:$0x1] %vm1897_vm4, %v2160_v20 }
0x2c3e   :  { %v2162_v30 = vpop.permute.xlu1 %2161 }
0x2c3f   :  { %2166 = vst.msk [vmem:[#allocation3 + $0xf] sm:$0x1] %vm1897_vm4, %v2162_v30 }
0x2c42   :  { %v2167_v25 = vld [vmem:[#allocation3] sm:$0xff] }
0x2c43   :  { %2615 = vmatprep.mubr.msk.f32.mxu1 %vm308_vm2, %v2167_v25 }
0x2c46   :  { %v2168_v31 = vld [vmem:[#allocation3 + $0x8] sm:$0xff] }
0x2c47   :  { %2616 = vmatmul.mubr.msk.f32.vlgmr.msra.gmra.mrb[16].mxu1 %vm308_vm2, %v2168_v31 }
0x2c48   :  { %2813 = shalt.err (!%p2810_p4)
}
0x2c49   :  { %s2814_s17 = scalar_lea.hbm %s3442_s13, 32 }
0x2c4a   :  { %p2815_p5 = scmp.ne.s32.totalorder %s3442_s13, %s2814_s17  ;;  %p2818_p6 = scmp.lt.u32.totalorder %s2814_s17, %s3442_s13 }
0x2c4c   :  { %p2820_p7 = pnand %p2818_p6, %p2815_p5 }
0x2c4e   :  { %2823 = shalt.err (!%p2820_p7)
}
0x2c4f   :  { %2279 = dma.vmem_to_hbm [thread:$0]  %s2277_s29, 32, %s3442_s13, [#allocation7]  }
0x2c50   :  { %s2880_s21 = smov [#allocation8]  }
0x2c51   :  { %s2286_s22 = sshll.u32 %s2880_s21, 4  ;;  %s2287_s22 = int_to_ptr.vmem [resolvable:$true] %s2286_s22 }
0x2c52   :  { %s2824_s3 = scalar_lea.vmem %s2287_s22, 32  ;;  %p2829_p9 = scmp.lt.s32.totalorder %s2287_s22, %s2287_s22 }
0x2c53   :  { %p2825_p8 = scmp.ne.s32.totalorder %s2287_s22, %s2824_s3  ;;  %p2830_p10 = scmp.lt.s32.totalorder %s2824_s3, %s2824_s3 }
0x2c55   :  { %p2831_p11 = por %p2830_p10, %p2829_p9 }
0x2c57   :  { %p2832_p12 = pnand %p2831_p11, %p2825_p8 }
0x2c59   :  { %2835 = shalt.err (!%p2832_p12)
}
0x2c5a   :  { %s2836_s24 = scalar_lea.hbm %s3443_s14, 32 }
0x2c5b   :  { %p2837_p13 = scmp.ne.s32.totalorder %s3443_s14, %s2836_s24  ;;  %p2840_p0 = scmp.lt.u32.totalorder %s2836_s24, %s3443_s14 }
0x2c5d   :  { %p2842_p1 = pnand %p2840_p0, %p2837_p13 }
0x2c5f   :  { %2845 = shalt.err (!%p2842_p1)
}
0x2c60   :  { %2289 = dma.vmem_to_hbm [thread:$0]  %s2287_s22, 32, %s3443_s14, [#allocation7]   ;;  %v2331_v32 = vld [vmem:[%s3438_s9] ss:$0 sm:$0xff] }
0x2c61   :  { %s2881_s1 = smov [#allocation4]  }
0x2c62   :  { %s2263_s5 = sshll.u32 %s2881_s1, 4  ;;  %s2264_s5 = int_to_ptr.vmem [resolvable:$true] %s2263_s5 }
0x2c63   :  { %s2846_s8 = scalar_lea.vmem %s2264_s5, 256  ;;  %p2851_p3 = scmp.lt.s32.totalorder %s2264_s5, %s2264_s5 }
0x2c64   :  { %p2847_p2 = scmp.ne.s32.totalorder %s2264_s5, %s2846_s8  ;;  %p2852_p4 = scmp.lt.s32.totalorder %s2846_s8, %s2846_s8 }
0x2c66   :  { %p2853_p5 = por %p2852_p4, %p2851_p3 }
0x2c68   :  { %p2854_p6 = pnand %p2853_p5, %p2847_p2 }
0x2d1a   :  { %v2617_v33 = vpop.f32.mrb[16].mxu1 }
0x2d1b   :  { %v2253_v34 = vadd.f32 %v2617_v33, %v2331_v32  ;;  %v2247_v35 = vpop.f32.mrb[17].mxu1 }
0x2d1c   :  { %v2248_v36 = vadd.f32 %v2331_v32, %v2247_v35 }
0x2d1d   :  { %2257 = vst.msk [vmem:[#allocation4 + $0x8] sm:$0xff] %vm91_vm0, %v2253_v34 }
0x2d1e   :  { %2256 = vst.msk [vmem:[#allocation4] sm:$0xff] %vm91_vm0, %v2248_v36 }
0x2d1f   :  { %2857 = shalt.err (!%p2854_p6)
}
0x2d20   :  { %s2858_s29 = scalar_lea.hbm %s3441_s12, 256 }
0x2d21   :  { %p2859_p7 = scmp.ne.s32.totalorder %s3441_s12, %s2858_s29  ;;  %p2862_p8 = scmp.lt.u32.totalorder %s2858_s29, %s3441_s12 }
0x2d23   :  { %p2864_p9 = pnand %p2862_p8, %p2859_p7 }
0x2d25   :  { %2867 = shalt.err (!%p2864_p9)
}
0x2d26   :  { %s2882_s18 = smov 128   ;;  %s2883_s19 = smov 8  }
0x2d27   :  { %2269 = dma.vmem_to_hbm [thread:$0]  %s2264_s5, 256, %s3441_s12, [#allocation5], %s2882_s18, %s2882_s18, %s2883_s19  }
0x2d28   :  { %2868 = dma.done.wait [#allocation5], 256  }
0x2d29   :  { %2869 = vsyncadd [#allocation5], 4294967040 }
0x2d2a   :  { %2870 = dma.done.wait [#allocation7], 64  }
0x2d2b   :  { %2871 = vsyncadd [#allocation7], 4294967232 }
0x2d2c   :  { %2299 = vsyncpa [#allocation5], 1 }
0x2d2d   :  { %2300 = vsyncpa [#allocation7], 1 }

</bundles_post_ra>
